<compile_context>
chip_gen: v7x
topology: tpu7x:2x2x1
jax: 0.10.0
libtpu: 0.0.40
codegen_flags: <defaults>
</compile_context>

<pallas_src>
import functools

import jax
import jax.numpy as jnp
from jax.experimental import pallas as pl
from jax.experimental.pallas import tpu as pltpu

EXPANSION = 4
BN_EPS = 1e-5
LANE = 128
VMEM_LIMIT_BYTES = 48 * 1024 * 1024  # below v7x's 64 MiB physical VMEM


def _round_up(x, m):
    return (x + m - 1) // m * m


def _pad_axis(a, axis, target):
    pad = target - a.shape[axis]
    if pad == 0:
        return a
    widths = [(0, 0)] * a.ndim
    widths[axis] = (0, pad)
    return jnp.pad(a, widths)


def _compiler_params(sem):
    return pltpu.CompilerParams(dimension_semantics=sem,
                                vmem_limit_bytes=VMEM_LIMIT_BYTES)


# ----------------------------------------------------------------------------
# Pallas kernels
# ----------------------------------------------------------------------------
def _mm_bn_kernel(x_ref, w_ref, b_ref, o_ref, acc_ref, *, nk, relu):
    """K-tiled matmul + folded-BN bias (+ ReLU).  grid = (M blocks, K blocks)."""
    k = pl.program_id(1)

    @pl.when(k == 0)
    def _init():
        acc_ref[...] = jnp.zeros_like(acc_ref)

    acc_ref[...] += jnp.dot(x_ref[...], w_ref[...],
                            preferred_element_type=jnp.float32)

    @pl.when(k == nk - 1)
    def _finalize():
        y = acc_ref[...] + b_ref[...]
        if relu:
            y = jnp.maximum(y, 0.0)
        o_ref[...] = y.astype(o_ref.dtype)


def _conv3x3_taps_kernel(x_ref, w_ref, b_ref, o_ref, acc_ref, *,
                         row_offs, ch_offs, cin, bm):
    """3x3 conv as 9 in-VMEM tap matmuls + bias + ReLU (no im2col in HBM).

    x_ref: (1, Rin, n_phases*cin) flattened, space-to-depth'd, padded image (f32)
    w_ref: (9*cin, cout)          tap-stacked weights, BN scale folded (bf16)
    o_ref: (1, Rout, cout)        flattened output rows (junk cols dropped later)
    """
    n_chunks = o_ref.shape[1] // bm
    for r in range(n_chunks):                       # static, unrolled
        base = r * bm
        for t in range(9):                          # static, unrolled taps
            # TODO(synk): keep the image block in bf16 once unaligned packed
            # sublane-offset slices are verified; f32 + in-kernel cast is the
            # safe path today (MXU still runs bf16).
            xs = x_ref[0, pl.ds(base + row_offs[t], bm),
                       pl.ds(ch_offs[t], cin)].astype(jnp.bfloat16)
            wt = w_ref[pl.ds(t * cin, cin), :]
            contrib = jnp.dot(xs, wt, preferred_element_type=jnp.float32)
            if t == 0:
                acc_ref[...] = contrib
            else:
                acc_ref[...] += contrib
        y = jnp.maximum(acc_ref[...] + b_ref[...], 0.0)
        o_ref[0, pl.ds(base, bm), :] = y.astype(o_ref.dtype)


def _mm_dual_add_relu_kernel(x1_ref, w1_ref, x2_ref, w2_ref, b_ref, o_ref):
    """Fused conv3 + projection shortcut: relu(x1@w1 + x2@w2 + bias)."""
    acc = jnp.dot(x1_ref[...], w1_ref[...], preferred_element_type=jnp.float32)
    acc = acc + jnp.dot(x2_ref[...], w2_ref[...],
                        preferred_element_type=jnp.float32)
    o_ref[...] = jnp.maximum(acc + b_ref[...], 0.0).astype(o_ref.dtype)


def _mm_residual_relu_kernel(x_ref, w_ref, b_ref, r_ref, o_ref):
    """Fused conv3 + identity shortcut: relu(x@w + bias + residual)."""
    acc = jnp.dot(x_ref[...], w_ref[...], preferred_element_type=jnp.float32)
    y = acc + b_ref[...] + r_ref[...].astype(jnp.float32)
    o_ref[...] = jnp.maximum(y, 0.0).astype(o_ref.dtype)


# ----------------------------------------------------------------------------
# pallas_call wrappers
# ----------------------------------------------------------------------------
def matmul_bn(x2d, w2d, bias, *, relu, out_dtype):
    """y = [relu](x2d @ w2d + bias), K-tiled, M padded to the tile size."""
    M, K = x2d.shape
    Kw, Co = w2d.shape
    assert K == Kw and K % LANE == 0 and Co % LANE == 0
    assert bias.shape == (1, Co)
    tm = 256 if M >= 512 else 128          # 256 fills the v6e/v7x MXU; ok on v5e
    Mp = _round_up(M, tm)
    x2d = _pad_axis(x2d, 0, Mp)
    tk = next(c for c in (512, 256, 128) if K % c == 0)
    nm, nk = Mp // tm, K // tk

    out = pl.pallas_call(
        functools.partial(_mm_bn_kernel, nk=nk, relu=relu),
        out_shape=jax.ShapeDtypeStruct((Mp, Co), out_dtype),
        grid=(nm, nk),
        in_specs=[
            pl.BlockSpec((tm, tk), lambda i, k: (i, k)),
            pl.BlockSpec((tk, Co), lambda i, k: (k, 0)),
            pl.BlockSpec((1, Co), lambda i, k: (0, 0)),
        ],
        out_specs=pl.BlockSpec((tm, Co), lambda i, k: (i, 0)),
        scratch_shapes=[pltpu.VMEM((tm, Co), jnp.float32)],
        compiler_params=_compiler_params(("parallel", "arbitrary")),
    )(x2d, w2d, bias)
    return out[:M]


def conv3x3_bn_relu(x_nhwc, w_taps, bias, stride):
    """3x3 / stride / pad=1 conv + BN + ReLU without materializing im2col."""
    N, H, W, Cp = x_nhwc.shape
    s = stride
    Co = w_taps.shape[1]
    Hout = (H - 1) // s + 1
    Wout = (W - 1) // s + 1

    # conv zero-padding (1px) + pad spatial dims up to a multiple of the stride
    Hp = _round_up(H + 2, s)
    Wp = _round_up(W + 2, s)
    xp = jnp.pad(x_nhwc, ((0, 0), (1, Hp - H - 1), (1, Wp - W - 1), (0, 0)))
    Hps, Wps = Hp // s, Wp // s
    # space-to-depth by the stride: strided taps become contiguous slices
    xsd = xp.reshape(N, Hps, s, Wps, s, Cp).transpose(0, 1, 3, 2, 4, 5)
    xf = xsd.reshape(N, Hps * Wps, s * s * Cp).astype(jnp.float32)

    row_offs = tuple((i // s) * Wps + (j // s) for i in range(3) for j in range(3))
    ch_offs = tuple(((i % s) * s + (j % s)) * Cp for i in range(3) for j in range(3))

    Rout = Hout * Wps                 # (Wps - Wout) junk columns dropped below
    bm = min(512, _round_up(Rout, 8))
    Rout_p = _round_up(Rout, bm)
    Rin_p = _round_up(max(Hps * Wps, Rout_p + max(row_offs)), 8)
    xf = _pad_axis(xf, 1, Rin_p)

    out = pl.pallas_call(
        functools.partial(_conv3x3_taps_kernel, row_offs=row_offs,
                          ch_offs=ch_offs, cin=Cp, bm=bm),
        out_shape=jax.ShapeDtypeStruct((N, Rout_p, Co), jnp.bfloat16),
        grid=(N,),
        in_specs=[
            pl.BlockSpec((1, Rin_p, s * s * Cp), lambda n: (n, 0, 0)),
            pl.BlockSpec((9 * Cp, Co), lambda n: (0, 0)),
            pl.BlockSpec((1, Co), lambda n: (0, 0)),
        ],
        out_specs=pl.BlockSpec((1, Rout_p, Co), lambda n: (n, 0, 0)),
        scratch_shapes=[pltpu.VMEM((bm, Co), jnp.float32)],
        compiler_params=_compiler_params(("parallel",)),
    )(xf, w_taps, bias)

    out = out[:, :Rout, :].reshape(N, Hout, Wps, Co)[:, :, :Wout, :]
    return out


def conv3_plus_shortcut(y2, w3, bias, *, xs=None, ws=None, res=None):
    """Final 1x1 conv + BN + shortcut + ReLU; projection shortcut fused."""
    M, K1 = y2.shape
    Co = w3.shape[1]
    tm = 256 if M >= 512 else 128
    Mp = _round_up(M, tm)
    nm = Mp // tm
    y2p = _pad_axis(y2, 0, Mp)

    if ws is not None:
        K2 = xs.shape[1]
        xsp = _pad_axis(xs, 0, Mp)
        out = pl.pallas_call(
            _mm_dual_add_relu_kernel,
            out_shape=jax.ShapeDtypeStruct((Mp, Co), jnp.float32),
            grid=(nm,),
            in_specs=[
                pl.BlockSpec((tm, K1), lambda i: (i, 0)),
                pl.BlockSpec((K1, Co), lambda i: (0, 0)),
                pl.BlockSpec((tm, K2), lambda i: (i, 0)),
                pl.BlockSpec((K2, Co), lambda i: (0, 0)),
                pl.BlockSpec((1, Co), lambda i: (0, 0)),
            ],
            out_specs=pl.BlockSpec((tm, Co), lambda i: (i, 0)),
            compiler_params=_compiler_params(("parallel",)),
        )(y2p, w3, xsp, ws, bias)
    else:
        resp = _pad_axis(res, 0, Mp)
        out = pl.pallas_call(
            _mm_residual_relu_kernel,
            out_shape=jax.ShapeDtypeStruct((Mp, Co), jnp.float32),
            grid=(nm,),
            in_specs=[
                pl.BlockSpec((tm, K1), lambda i: (i, 0)),
                pl.BlockSpec((K1, Co), lambda i: (0, 0)),
                pl.BlockSpec((1, Co), lambda i: (0, 0)),
                pl.BlockSpec((tm, Co), lambda i: (i, 0)),
            ],
            out_specs=pl.BlockSpec((tm, Co), lambda i: (i, 0)),
            compiler_params=_compiler_params(("parallel",)),
        )(y2p, w3, bias, resp)
    return out[:M]


# ----------------------------------------------------------------------------
# Parameter prep: fold BN (eval-mode running stats) into padded bf16 weights
# ----------------------------------------------------------------------------
def _fold_bn(bn):
    gamma, beta, mean, var = bn
    scale = gamma / jnp.sqrt(var + BN_EPS)
    bias = beta - mean * scale
    return scale, bias


def _prep_1x1(w_oihw, bn):
    scale, bias = _fold_bn(bn)
    cout, cin = w_oihw.shape[0], w_oihw.shape[1]
    cin_p, cout_p = _round_up(cin, LANE), _round_up(cout, LANE)
    w = w_oihw[:, :, 0, 0].T * scale[None, :]
    w = jnp.pad(w, ((0, cin_p - cin), (0, cout_p - cout))).astype(jnp.bfloat16)
    b = jnp.pad(bias, (0, cout_p - cout)).reshape(1, cout_p).astype(jnp.float32)
    return w, b


def _prep_3x3(w_oihw, bn):
    scale, bias = _fold_bn(bn)
    cout, cin, kh, kw = w_oihw.shape
    cin_p, cout_p = _round_up(cin, LANE), _round_up(cout, LANE)
    w = jnp.transpose(w_oihw, (2, 3, 1, 0)) * scale[None, None, None, :]
    w = jnp.pad(w, ((0, 0), (0, 0), (0, cin_p - cin), (0, cout_p - cout)))
    w = w.reshape(kh * kw * cin_p, cout_p).astype(jnp.bfloat16)
    b = jnp.pad(bias, (0, cout_p - cout)).reshape(1, cout_p).astype(jnp.float32)
    return w, b


# ----------------------------------------------------------------------------
# BottleNeck forward
# ----------------------------------------------------------------------------
@functools.partial(jax.jit, static_argnums=(2,))
def bottleneck_forward(x_nchw, params, stride):
    # NCHW (PyTorch) -> NHWC, channels zero-padded to a lane-dense multiple of 128
    x = jnp.transpose(x_nchw, (0, 2, 3, 1)).astype(jnp.float32)
    N, H, W, Cin = x.shape
    cin_p = _round_up(Cin, LANE)
    x_f32 = _pad_axis(x, 3, cin_p)
    x_bf = x_f32.astype(jnp.bfloat16)

    w1, b1 = _prep_1x1(params["w1"], params["bn1"])
    w2, b2 = _prep_3x3(params["w2"], params["bn2"])
    w3, b3 = _prep_1x1(params["w3"], params["bn3"])
    cmid_p = w1.shape[1]
    cexp = params["w3"].shape[0]

    # 1x1 conv + BN + ReLU (bf16 intermediate)
    y1 = matmul_bn(x_bf.reshape(N * H * W, cin_p), w1, b1,
                   relu=True, out_dtype=jnp.bfloat16)
    y1 = y1.reshape(N, H, W, cmid_p)

    # 3x3 conv (stride, pad=1) + BN + ReLU (in-kernel tap accumulation)
    y2 = conv3x3_bn_relu(y1, w2, b2, stride)
    _, Hout, Wout, _ = y2.shape
    M2 = N * Hout * Wout
    y2 = y2.reshape(M2, cmid_p)

    # final 1x1 conv + BN + shortcut + ReLU (single fused kernel)
    if "ws" in params:
        wsm, bs = _prep_1x1(params["ws"], params["bns"])
        xs = x_bf[:, ::stride, ::stride, :].reshape(M2, cin_p)
        out2d = conv3_plus_shortcut(y2, w3, b3 + bs, xs=xs, ws=wsm)
    else:
        res = x_f32.reshape(M2, cin_p)      # identity shortcut kept in f32
        out2d = conv3_plus_shortcut(y2, w3, b3, res=res)

    out = out2d[:, :cexp].reshape(N, Hout, Wout, cexp)
    return jnp.transpose(out, (0, 3, 1, 2))  # back to NCHW


# ----------------------------------------------------------------------------
# Deterministic synthetic parameters + pure-JAX reference (lax.conv)
# ----------------------------------------------------------------------------
def init_bottleneck_params(key, in_channels, out_channels, stride):
    c_exp = out_channels * EXPANSION
    ks = list(jax.random.split(key, 8))

    def conv_w(k, cout, cin, kh, kw):
        fan_in = cin * kh * kw
        return jax.random.normal(k, (cout, cin, kh, kw), jnp.float32) * (2.0 / fan_in) ** 0.5

    def bn_p(k, c):
        k1, k2, k3, k4 = jax.random.split(k, 4)
        gamma = 1.0 + 0.1 * jax.random.normal(k1, (c,), jnp.float32)
        beta = 0.1 * jax.random.normal(k2, (c,), jnp.float32)
        mean = 0.1 * jax.random.normal(k3, (c,), jnp.float32)
        var = jnp.abs(jax.random.normal(k4, (c,), jnp.float32)) + 0.5
        return gamma, beta, mean, var

    p = {
        "w1": conv_w(ks[0], out_channels, in_channels, 1, 1),
        "bn1": bn_p(ks[1], out_channels),
        "w2": conv_w(ks[2], out_channels, out_channels, 3, 3),
        "bn2": bn_p(ks[3], out_channels),
        "w3": conv_w(ks[4], c_exp, out_channels, 1, 1),
        "bn3": bn_p(ks[5], c_exp),
    }
    if stride != 1 or in_channels != c_exp:
        p["ws"] = conv_w(ks[6], c_exp, in_channels, 1, 1)
        p["bns"] = bn_p(ks[7], c_exp)
    return p


def _ref_conv(x, w, stride, padding):
    return jax.lax.conv_general_dilated(
        x, w, (stride, stride), [(padding, padding)] * 2,
        dimension_numbers=("NCHW", "OIHW", "NCHW"))


def _ref_bn(x, bn):
    gamma, beta, mean, var = bn
    s = (gamma / jnp.sqrt(var + BN_EPS)).reshape(1, -1, 1, 1)
    b = (beta - mean * gamma / jnp.sqrt(var + BN_EPS)).reshape(1, -1, 1, 1)
    return x * s + b


def bottleneck_reference(x, p, stride):
    y = jax.nn.relu(_ref_bn(_ref_conv(x, p["w1"], 1, 0), p["bn1"]))
    y = jax.nn.relu(_ref_bn(_ref_conv(y, p["w2"], stride, 1), p["bn2"]))
    y = _ref_bn(_ref_conv(y, p["w3"], 1, 0), p["bn3"])
    sc = _ref_bn(_ref_conv(x, p["ws"], stride, 0), p["bns"]) if "ws" in p else x
    return jax.nn.relu(y + sc)


# ----------------------------------------------------------------------------
if __name__ == "__main__":
    key = jax.random.PRNGKey(0)

    configs = [
        # (N, in_channels, H, W, out_channels, stride)
        (2, 16, 16, 16, 8, 2),   # projection shortcut + strided 3x3
        (2, 32, 16, 16, 8, 1),   # identity shortcut + stride-1 3x3
    ]
    for idx, (N, cin, H, W, cout, stride) in enumerate(configs):
        k_x, k_p = jax.random.split(jax.random.fold_in(key, idx))
        x = jax.random.normal(k_x, (N, cin, H, W), jnp.float32)
        params = init_bottleneck_params(k_p, cin, cout, stride)

        out = jax.block_until_ready(bottleneck_forward(x, params, stride))
        ref = jax.block_until_ready(bottleneck_reference(x, params, stride))

        assert out.shape == ref.shape, (out.shape, ref.shape)
        err = float(jnp.max(jnp.abs(out - ref)))
        scale = float(jnp.max(jnp.abs(ref))) + 1e-6
        # bf16 MXU inputs -> looser tolerance than the old f32 check
        assert err / scale < 5e-2, (idx, err, scale)

    print("KERNEL_OK")
</pallas_src>

<mosaic_0001>
module attributes {stable_mosaic.version = 11 : i64} {
  func.func @_mm_bn_kernel(%arg0: i32, %arg1: i32, %arg2: memref<256x128xbf16, #tpu.memory_space<vmem>>, %arg3: memref<128x128xbf16, #tpu.memory_space<vmem>>, %arg4: memref<1x128xf32, #tpu.memory_space<vmem>>, %arg5: memref<256x128xbf16, #tpu.memory_space<vmem>>, %arg6: memref<256x128xf32, #tpu.memory_space<vmem>>) attributes {dimension_semantics = [#tpu.dimension_semantics<parallel>, #tpu.dimension_semantics<arbitrary>], iteration_bounds = array<i64: 2, 1>, scalar_prefetch = 0 : i64, scratch_operands = 1 : i64, tpu.core_type = #tpu.core_type<tc>, window_params = [{transform_indices = @transform_0, window_bounds = array<i64: 256, 128>}, {transform_indices = @transform_1, window_bounds = array<i64: 128, 128>}, {pipeline_mode = #tpu.pipeline_mode<synchronous>, transform_indices = @transform_2, window_bounds = array<i64: 1, 128>}, {transform_indices = @transform_3, window_bounds = array<i64: 256, 128>}]} {
    %c0_i32 = arith.constant 0 : i32
    %0 = arith.cmpi eq, %arg1, %c0_i32 : i32
    %1 = arith.extui %0 : i1 to i32
    %c0_i32_0 = arith.constant 0 : i32
    %2 = arith.cmpi ne, %1, %c0_i32_0 : i32
    scf.if %2 {
      %cst_10 = arith.constant 0.000000e+00 : f32
      %12 = vector.broadcast %cst_10 : f32 to vector<256x128xf32>
      %c0_11 = arith.constant 0 : index
      %c0_12 = arith.constant 0 : index
      %13 = vector.load %arg6[%c0_11, %c0_12] : memref<256x128xf32, #tpu.memory_space<vmem>>, vector<256x128xf32>
      tpu.vector_store %arg6[%c0_11, %c0_12], %12 {strides = array<i32>} : memref<256x128xf32, #tpu.memory_space<vmem>>, vector<256x128xf32>,
    } else {
    }
    %c0 = arith.constant 0 : index
    %c0_1 = arith.constant 0 : index
    %3 = vector.load %arg6[%c0, %c0_1] : memref<256x128xf32, #tpu.memory_space<vmem>>, vector<256x128xf32>
    %c0_2 = arith.constant 0 : index
    %c0_3 = arith.constant 0 : index
    %4 = vector.load %arg2[%c0_2, %c0_3] : memref<256x128xbf16, #tpu.memory_space<vmem>>, vector<256x128xbf16>
    %c0_4 = arith.constant 0 : index
    %c0_5 = arith.constant 0 : index
    %5 = vector.load %arg3[%c0_4, %c0_5] : memref<128x128xbf16, #tpu.memory_space<vmem>>, vector<128x128xbf16>
    %cst = arith.constant dense<0.000000e+00> : vector<256x128xf32>
    %6 = tpu.matmul %4, %5, %cst {dimension_numbers = #tpu.dot_dimension_numbers<[1], [0], [0], [1], [0, 0, 1, 1], [], []>} : vector<256x128xbf16>, vector<128x128xbf16>, vector<256x128xf32> -> vector<256x128xf32>
    %7 = arith.addf %3, %6 : vector<256x128xf32>
    %c0_6 = arith.constant 0 : index
    %c0_7 = arith.constant 0 : index
    %8 = vector.load %arg6[%c0_6, %c0_7] : memref<256x128xf32, #tpu.memory_space<vmem>>, vector<256x128xf32>
    tpu.vector_store %arg6[%c0_6, %c0_7], %7 {strides = array<i32>} : memref<256x128xf32, #tpu.memory_space<vmem>>, vector<256x128xf32>,
    %c0_i32_8 = arith.constant 0 : i32
    %9 = arith.cmpi eq, %arg1, %c0_i32_8 : i32
    %10 = arith.extui %9 : i1 to i32
    %c0_i32_9 = arith.constant 0 : i32
    %11 = arith.cmpi ne, %10, %c0_i32_9 : i32
    scf.if %11 {
      %c0_10 = arith.constant 0 : index
      %c0_11 = arith.constant 0 : index
      %12 = vector.load %arg6[%c0_10, %c0_11] : memref<256x128xf32, #tpu.memory_space<vmem>>, vector<256x128xf32>
      %c0_12 = arith.constant 0 : index
      %c0_13 = arith.constant 0 : index
      %13 = vector.load %arg4[%c0_12, %c0_13] : memref<1x128xf32, #tpu.memory_space<vmem>>, vector<1x128xf32>
      %14 = vector.broadcast %13 : vector<1x128xf32> to vector<256x128xf32>
      %15 = arith.addf %12, %14 : vector<256x128xf32>
      %cst_14 = arith.constant 0.000000e+00 : f32
      %16 = vector.broadcast %cst_14 : f32 to vector<256x128xf32>
      %17 = arith.maximumf %15, %16 : vector<256x128xf32>
      %18 = arith.truncf %17 : vector<256x128xf32> to vector<256x128xbf16>
      %c0_15 = arith.constant 0 : index
      %c0_16 = arith.constant 0 : index
      %19 = vector.load %arg5[%c0_15, %c0_16] : memref<256x128xbf16, #tpu.memory_space<vmem>>, vector<256x128xbf16>
      tpu.vector_store %arg5[%c0_15, %c0_16], %18 {strides = array<i32>} : memref<256x128xbf16, #tpu.memory_space<vmem>>, vector<256x128xbf16>,
    } else {
    }
    return
  }
  func.func @transform_0(%arg0: i32, %arg1: i32) -> (i32, i32) {
    %c0_i32 = arith.constant 0 : i32
    return %arg0, %arg1 : i32, i32
  }
  func.func @transform_1(%arg0: i32, %arg1: i32) -> (i32, i32) {
    %c0_i32 = arith.constant 0 : i32
    %c0_i32_0 = arith.constant 0 : i32
    return %arg1, %c0_i32 : i32, i32
  }
  func.func @transform_2(%arg0: i32, %arg1: i32) -> (i32, i32) {
    %c0_i32 = arith.constant 0 : i32
    %c0_i32_0 = arith.constant 0 : i32
    %c0_i32_1 = arith.constant 0 : i32
    return %c0_i32, %c0_i32_0 : i32, i32
  }
  func.func @transform_3(%arg0: i32, %arg1: i32) -> (i32, i32) {
    %c0_i32 = arith.constant 0 : i32
    %c0_i32_0 = arith.constant 0 : i32
    return %arg0, %c0_i32 : i32, i32
  }
}

module attributes {stable_mosaic.version = 11 : i64} {
  func.func @_conv3x3_taps_kernel(%arg0: i32, %arg1: memref<1x88x512xf32, #tpu.memory_space<vmem>>, %arg2: memref<1152x128xbf16, #tpu.memory_space<vmem>>, %arg3: memref<1x128xf32, #tpu.memory_space<vmem>>, %arg4: memref<1x72x128xbf16, #tpu.memory_space<vmem>>, %arg5: memref<72x128xf32, #tpu.memory_space<vmem>>) attributes {dimension_semantics = [#tpu.dimension_semantics<parallel>], iteration_bounds = array<i64: 2>, scalar_prefetch = 0 : i64, scratch_operands = 1 : i64, tpu.core_type = #tpu.core_type<tc>, window_params = [{transform_indices = @transform_0, window_bounds = array<i64: 1, 88, 512>}, {pipeline_mode = #tpu.pipeline_mode<synchronous>, transform_indices = @transform_1, window_bounds = array<i64: 1152, 128>}, {pipeline_mode = #tpu.pipeline_mode<synchronous>, transform_indices = @transform_2, window_bounds = array<i64: 1, 128>}, {transform_indices = @transform_3, window_bounds = array<i64: 1, 72, 128>}]} {
    %c0 = arith.constant 0 : index
    %c0_0 = arith.constant 0 : index
    %c0_1 = arith.constant 0 : index
    %0 = vector.load %arg1[%c0, %c0_0, %c0_1] : memref<1x88x512xf32, #tpu.memory_space<vmem>>, vector<1x72x128xf32>
    %1 = vector.shape_cast %0 : vector<1x72x128xf32> to vector<72x128xf32>
    %2 = arith.truncf %1 : vector<72x128xf32> to vector<72x128xbf16>
    %c0_2 = arith.constant 0 : index
    %c0_3 = arith.constant 0 : index
    %3 = vector.load %arg2[%c0_2, %c0_3] : memref<1152x128xbf16, #tpu.memory_space<vmem>>, vector<128x128xbf16>
    %cst = arith.constant dense<0.000000e+00> : vector<72x128xf32>
    %4 = tpu.matmul %2, %3, %cst {dimension_numbers = #tpu.dot_dimension_numbers<[1], [0], [0], [1], [0, 0, 1, 1], [], []>} : vector<72x128xbf16>, vector<128x128xbf16>, vector<72x128xf32> -> vector<72x128xf32>
    %c0_4 = arith.constant 0 : index
    %c0_5 = arith.constant 0 : index
    %5 = vector.load %arg5[%c0_4, %c0_5] : memref<72x128xf32, #tpu.memory_space<vmem>>, vector<72x128xf32>
    tpu.vector_store %arg5[%c0_4, %c0_5], %4 {strides = array<i32>} : memref<72x128xf32, #tpu.memory_space<vmem>>, vector<72x128xf32>,
    %c0_6 = arith.constant 0 : index
    %c0_7 = arith.constant 0 : index
    %c128 = arith.constant 128 : index
    %6 = vector.load %arg1[%c0_6, %c0_7, %c128] : memref<1x88x512xf32, #tpu.memory_space<vmem>>, vector<1x72x128xf32>
    %7 = vector.shape_cast %6 : vector<1x72x128xf32> to vector<72x128xf32>
    %8 = arith.truncf %7 : vector<72x128xf32> to vector<72x128xbf16>
    %c128_8 = arith.constant 128 : index
    %c0_9 = arith.constant 0 : index
    %9 = vector.load %arg2[%c128_8, %c0_9] : memref<1152x128xbf16, #tpu.memory_space<vmem>>, vector<128x128xbf16>
    %cst_10 = arith.constant dense<0.000000e+00> : vector<72x128xf32>
    %10 = tpu.matmul %8, %9, %cst_10 {dimension_numbers = #tpu.dot_dimension_numbers<[1], [0], [0], [1], [0, 0, 1, 1], [], []>} : vector<72x128xbf16>, vector<128x128xbf16>, vector<72x128xf32> -> vector<72x128xf32>
    %c0_11 = arith.constant 0 : index
    %c0_12 = arith.constant 0 : index
    %11 = vector.load %arg5[%c0_11, %c0_12] : memref<72x128xf32, #tpu.memory_space<vmem>>, vector<72x128xf32>
    %12 = arith.addf %11, %10 : vector<72x128xf32>
    %c0_13 = arith.constant 0 : index
    %c0_14 = arith.constant 0 : index
    %13 = vector.load %arg5[%c0_13, %c0_14] : memref<72x128xf32, #tpu.memory_space<vmem>>, vector<72x128xf32>
    tpu.vector_store %arg5[%c0_13, %c0_14], %12 {strides = array<i32>} : memref<72x128xf32, #tpu.memory_space<vmem>>, vector<72x128xf32>,
    %c0_15 = arith.constant 0 : index
    %c1 = arith.constant 1 : index
    %c0_16 = arith.constant 0 : index
    %14 = vector.load %arg1[%c0_15, %c1, %c0_16] : memref<1x88x512xf32, #tpu.memory_space<vmem>>, vector<1x72x128xf32>
    %15 = vector.shape_cast %14 : vector<1x72x128xf32> to vector<72x128xf32>
    %16 = arith.truncf %15 : vector<72x128xf32> to vector<72x128xbf16>
    %c256 = arith.constant 256 : index
    %c0_17 = arith.constant 0 : index
    %17 = vector.load %arg2[%c256, %c0_17] : memref<1152x128xbf16, #tpu.memory_space<vmem>>, vector<128x128xbf16>
    %cst_18 = arith.constant dense<0.000000e+00> : vector<72x128xf32>
    %18 = tpu.matmul %16, %17, %cst_18 {dimension_numbers = #tpu.dot_dimension_numbers<[1], [0], [0], [1], [0, 0, 1, 1], [], []>} : vector<72x128xbf16>, vector<128x128xbf16>, vector<72x128xf32> -> vector<72x128xf32>
    %c0_19 = arith.constant 0 : index
    %c0_20 = arith.constant 0 : index
    %19 = vector.load %arg5[%c0_19, %c0_20] : memref<72x128xf32, #tpu.memory_space<vmem>>, vector<72x128xf32>
    %20 = arith.addf %19, %18 : vector<72x128xf32>
    %c0_21 = arith.constant 0 : index
    %c0_22 = arith.constant 0 : index
    %21 = vector.load %arg5[%c0_21, %c0_22] : memref<72x128xf32, #tpu.memory_space<vmem>>, vector<72x128xf32>
    tpu.vector_store %arg5[%c0_21, %c0_22], %20 {strides = array<i32>} : memref<72x128xf32, #tpu.memory_space<vmem>>, vector<72x128xf32>,
    %c0_23 = arith.constant 0 : index
    %c0_24 = arith.constant 0 : index
    %c256_25 = arith.constant 256 : index
    %22 = vector.load %arg1[%c0_23, %c0_24, %c256_25] : memref<1x88x512xf32, #tpu.memory_space<vmem>>, vector<1x72x128xf32>
    %23 = vector.shape_cast %22 : vector<1x72x128xf32> to vector<72x128xf32>
    %24 = arith.truncf %23 : vector<72x128xf32> to vector<72x128xbf16>
    %c384 = arith.constant 384 : index
    %c0_26 = arith.constant 0 : index
    %25 = vector.load %arg2[%c384, %c0_26] : memref<1152x128xbf16, #tpu.memory_space<vmem>>, vector<128x128xbf16>
    %cst_27 = arith.constant dense<0.000000e+00> : vector<72x128xf32>
    %26 = tpu.matmul %24, %25, %cst_27 {dimension_numbers = #tpu.dot_dimension_numbers<[1], [0], [0], [1], [0, 0, 1, 1], [], []>} : vector<72x128xbf16>, vector<128x128xbf16>, vector<72x128xf32> -> vector<72x128xf32>
    %c0_28 = arith.constant 0 : index
    %c0_29 = arith.constant 0 : index
    %27 = vector.load %arg5[%c0_28, %c0_29] : memref<72x128xf32, #tpu.memory_space<vmem>>, vector<72x128xf32>
    %28 = arith.addf %27, %26 : vector<72x128xf32>
    %c0_30 = arith.constant 0 : index
    %c0_31 = arith.constant 0 : index
    %29 = vector.load %arg5[%c0_30, %c0_31] : memref<72x128xf32, #tpu.memory_space<vmem>>, vector<72x128xf32>
    tpu.vector_store %arg5[%c0_30, %c0_31], %28 {strides = array<i32>} : memref<72x128xf32, #tpu.memory_space<vmem>>, vector<72x128xf32>,
    %c0_32 = arith.constant 0 : index
    %c0_33 = arith.constant 0 : index
    %c384_34 = arith.constant 384 : index
    %30 = vector.load %arg1[%c0_32, %c0_33, %c384_34] : memref<1x88x512xf32, #tpu.memory_space<vmem>>, vector<1x72x128xf32>
    %31 = vector.shape_cast %30 : vector<1x72x128xf32> to vector<72x128xf32>
    %32 = arith.truncf %31 : vector<72x128xf32> to vector<72x128xbf16>
    %c512 = arith.constant 512 : index
    %c0_35 = arith.constant 0 : index
    %33 = vector.load %arg2[%c512, %c0_35] : memref<1152x128xbf16, #tpu.memory_space<vmem>>, vector<128x128xbf16>
    %cst_36 = arith.constant dense<0.000000e+00> : vector<72x128xf32>
    %34 = tpu.matmul %32, %33, %cst_36 {dimension_numbers = #tpu.dot_dimension_numbers<[1], [0], [0], [1], [0, 0, 1, 1], [], []>} : vector<72x128xbf16>, vector<128x128xbf16>, vector<72x128xf32> -> vector<72x128xf32>
    %c0_37 = arith.constant 0 : index
    %c0_38 = arith.constant 0 : index
    %35 = vector.load %arg5[%c0_37, %c0_38] : memref<72x128xf32, #tpu.memory_space<vmem>>, vector<72x128xf32>
    %36 = arith.addf %35, %34 : vector<72x128xf32>
    %c0_39 = arith.constant 0 : index
    %c0_40 = arith.constant 0 : index
    %37 = vector.load %arg5[%c0_39, %c0_40] : memref<72x128xf32, #tpu.memory_space<vmem>>, vector<72x128xf32>
    tpu.vector_store %arg5[%c0_39, %c0_40], %36 {strides = array<i32>} : memref<72x128xf32, #tpu.memory_space<vmem>>, vector<72x128xf32>,
    %c0_41 = arith.constant 0 : index
    %c1_42 = arith.constant 1 : index
    %c256_43 = arith.constant 256 : index
    %38 = vector.load %arg1[%c0_41, %c1_42, %c256_43] : memref<1x88x512xf32, #tpu.memory_space<vmem>>, vector<1x72x128xf32>
    %39 = vector.shape_cast %38 : vector<1x72x128xf32> to vector<72x128xf32>
    %40 = arith.truncf %39 : vector<72x128xf32> to vector<72x128xbf16>
    %c640 = arith.constant 640 : index
    %c0_44 = arith.constant 0 : index
    %41 = vector.load %arg2[%c640, %c0_44] : memref<1152x128xbf16, #tpu.memory_space<vmem>>, vector<128x128xbf16>
    %cst_45 = arith.constant dense<0.000000e+00> : vector<72x128xf32>
    %42 = tpu.matmul %40, %41, %cst_45 {dimension_numbers = #tpu.dot_dimension_numbers<[1], [0], [0], [1], [0, 0, 1, 1], [], []>} : vector<72x128xbf16>, vector<128x128xbf16>, vector<72x128xf32> -> vector<72x128xf32>
    %c0_46 = arith.constant 0 : index
    %c0_47 = arith.constant 0 : index
    %43 = vector.load %arg5[%c0_46, %c0_47] : memref<72x128xf32, #tpu.memory_space<vmem>>, vector<72x128xf32>
    %44 = arith.addf %43, %42 : vector<72x128xf32>
    %c0_48 = arith.constant 0 : index
    %c0_49 = arith.constant 0 : index
    %45 = vector.load %arg5[%c0_48, %c0_49] : memref<72x128xf32, #tpu.memory_space<vmem>>, vector<72x128xf32>
    tpu.vector_store %arg5[%c0_48, %c0_49], %44 {strides = array<i32>} : memref<72x128xf32, #tpu.memory_space<vmem>>, vector<72x128xf32>,
    %c0_50 = arith.constant 0 : index
    %c9 = arith.constant 9 : index
    %c0_51 = arith.constant 0 : index
    %46 = vector.load %arg1[%c0_50, %c9, %c0_51] : memref<1x88x512xf32, #tpu.memory_space<vmem>>, vector<1x72x128xf32>
    %47 = vector.shape_cast %46 : vector<1x72x128xf32> to vector<72x128xf32>
    %48 = arith.truncf %47 : vector<72x128xf32> to vector<72x128xbf16>
    %c768 = arith.constant 768 : index
    %c0_52 = arith.constant 0 : index
    %49 = vector.load %arg2[%c768, %c0_52] : memref<1152x128xbf16, #tpu.memory_space<vmem>>, vector<128x128xbf16>
    %cst_53 = arith.constant dense<0.000000e+00> : vector<72x128xf32>
    %50 = tpu.matmul %48, %49, %cst_53 {dimension_numbers = #tpu.dot_dimension_numbers<[1], [0], [0], [1], [0, 0, 1, 1], [], []>} : vector<72x128xbf16>, vector<128x128xbf16>, vector<72x128xf32> -> vector<72x128xf32>
    %c0_54 = arith.constant 0 : index
    %c0_55 = arith.constant 0 : index
    %51 = vector.load %arg5[%c0_54, %c0_55] : memref<72x128xf32, #tpu.memory_space<vmem>>, vector<72x128xf32>
    %52 = arith.addf %51, %50 : vector<72x128xf32>
    %c0_56 = arith.constant 0 : index
    %c0_57 = arith.constant 0 : index
    %53 = vector.load %arg5[%c0_56, %c0_57] : memref<72x128xf32, #tpu.memory_space<vmem>>, vector<72x128xf32>
    tpu.vector_store %arg5[%c0_56, %c0_57], %52 {strides = array<i32>} : memref<72x128xf32, #tpu.memory_space<vmem>>, vector<72x128xf32>,
    %c0_58 = arith.constant 0 : index
    %c9_59 = arith.constant 9 : index
    %c128_60 = arith.constant 128 : index
    %54 = vector.load %arg1[%c0_58, %c9_59, %c128_60] : memref<1x88x512xf32, #tpu.memory_space<vmem>>, vector<1x72x128xf32>
    %55 = vector.shape_cast %54 : vector<1x72x128xf32> to vector<72x128xf32>
    %56 = arith.truncf %55 : vector<72x128xf32> to vector<72x128xbf16>
    %c896 = arith.constant 896 : index
    %c0_61 = arith.constant 0 : index
    %57 = vector.load %arg2[%c896, %c0_61] : memref<1152x128xbf16, #tpu.memory_space<vmem>>, vector<128x128xbf16>
    %cst_62 = arith.constant dense<0.000000e+00> : vector<72x128xf32>
    %58 = tpu.matmul %56, %57, %cst_62 {dimension_numbers = #tpu.dot_dimension_numbers<[1], [0], [0], [1], [0, 0, 1, 1], [], []>} : vector<72x128xbf16>, vector<128x128xbf16>, vector<72x128xf32> -> vector<72x128xf32>
    %c0_63 = arith.constant 0 : index
    %c0_64 = arith.constant 0 : index
    %59 = vector.load %arg5[%c0_63, %c0_64] : memref<72x128xf32, #tpu.memory_space<vmem>>, vector<72x128xf32>
    %60 = arith.addf %59, %58 : vector<72x128xf32>
    %c0_65 = arith.constant 0 : index
    %c0_66 = arith.constant 0 : index
    %61 = vector.load %arg5[%c0_65, %c0_66] : memref<72x128xf32, #tpu.memory_space<vmem>>, vector<72x128xf32>
    tpu.vector_store %arg5[%c0_65, %c0_66], %60 {strides = array<i32>} : memref<72x128xf32, #tpu.memory_space<vmem>>, vector<72x128xf32>,
    %c0_67 = arith.constant 0 : index
    %c10 = arith.constant 10 : index
    %c0_68 = arith.constant 0 : index
    %62 = vector.load %arg1[%c0_67, %c10, %c0_68] : memref<1x88x512xf32, #tpu.memory_space<vmem>>, vector<1x72x128xf32>
    %63 = vector.shape_cast %62 : vector<1x72x128xf32> to vector<72x128xf32>
    %64 = arith.truncf %63 : vector<72x128xf32> to vector<72x128xbf16>
    %c1024 = arith.constant 1024 : index
    %c0_69 = arith.constant 0 : index
    %65 = vector.load %arg2[%c1024, %c0_69] : memref<1152x128xbf16, #tpu.memory_space<vmem>>, vector<128x128xbf16>
    %cst_70 = arith.constant dense<0.000000e+00> : vector<72x128xf32>
    %66 = tpu.matmul %64, %65, %cst_70 {dimension_numbers = #tpu.dot_dimension_numbers<[1], [0], [0], [1], [0, 0, 1, 1], [], []>} : vector<72x128xbf16>, vector<128x128xbf16>, vector<72x128xf32> -> vector<72x128xf32>
    %c0_71 = arith.constant 0 : index
    %c0_72 = arith.constant 0 : index
    %67 = vector.load %arg5[%c0_71, %c0_72] : memref<72x128xf32, #tpu.memory_space<vmem>>, vector<72x128xf32>
    %68 = arith.addf %67, %66 : vector<72x128xf32>
    %c0_73 = arith.constant 0 : index
    %c0_74 = arith.constant 0 : index
    %69 = vector.load %arg5[%c0_73, %c0_74] : memref<72x128xf32, #tpu.memory_space<vmem>>, vector<72x128xf32>
    tpu.vector_store %arg5[%c0_73, %c0_74], %68 {strides = array<i32>} : memref<72x128xf32, #tpu.memory_space<vmem>>, vector<72x128xf32>,
    %c0_75 = arith.constant 0 : index
    %c0_76 = arith.constant 0 : index
    %70 = vector.load %arg5[%c0_75, %c0_76] : memref<72x128xf32, #tpu.memory_space<vmem>>, vector<72x128xf32>
    %c0_77 = arith.constant 0 : index
    %c0_78 = arith.constant 0 : index
    %71 = vector.load %arg3[%c0_77, %c0_78] : memref<1x128xf32, #tpu.memory_space<vmem>>, vector<1x128xf32>
    %72 = vector.broadcast %71 : vector<1x128xf32> to vector<72x128xf32>
    %73 = arith.addf %70, %72 : vector<72x128xf32>
    %cst_79 = arith.constant 0.000000e+00 : f32
    %74 = vector.broadcast %cst_79 : f32 to vector<72x128xf32>
    %75 = arith.maximumf %73, %74 : vector<72x128xf32>
    %76 = arith.truncf %75 : vector<72x128xf32> to vector<72x128xbf16>
    %c0_80 = arith.constant 0 : index
    %c0_81 = arith.constant 0 : index
    %c0_82 = arith.constant 0 : index
    %77 = vector.load %arg4[%c0_80, %c0_81, %c0_82] : memref<1x72x128xbf16, #tpu.memory_space<vmem>>, vector<1x72x128xbf16>
    %78 = vector.shape_cast %77 : vector<1x72x128xbf16> to vector<72x128xbf16>
    %79 = vector.shape_cast %76 : vector<72x128xbf16> to vector<1x72x128xbf16>
    tpu.vector_store %arg4[%c0_80, %c0_81, %c0_82], %79 {strides = array<i32>} : memref<1x72x128xbf16, #tpu.memory_space<vmem>>, vector<1x72x128xbf16>,
    return
  }
  func.func @transform_0(%arg0: i32) -> (i32, i32, i32) {
    %c0_i32 = arith.constant 0 : i32
    %c0_i32_0 = arith.constant 0 : i32
    %c0_i32_1 = arith.constant 0 : i32
    return %arg0, %c0_i32, %c0_i32_0 : i32, i32, i32
  }
  func.func @transform_1(%arg0: i32) -> (i32, i32) {
    %c0_i32 = arith.constant 0 : i32
    %c0_i32_0 = arith.constant 0 : i32
    %c0_i32_1 = arith.constant 0 : i32
    return %c0_i32, %c0_i32_0 : i32, i32
  }
  func.func @transform_2(%arg0: i32) -> (i32, i32) {
    %c0_i32 = arith.constant 0 : i32
    %c0_i32_0 = arith.constant 0 : i32
    %c0_i32_1 = arith.constant 0 : i32
    return %c0_i32, %c0_i32_0 : i32, i32
  }
  func.func @transform_3(%arg0: i32) -> (i32, i32, i32) {
    %c0_i32 = arith.constant 0 : i32
    %c0_i32_0 = arith.constant 0 : i32
    %c0_i32_1 = arith.constant 0 : i32
    return %arg0, %c0_i32, %c0_i32_0 : i32, i32, i32
  }
}

module attributes {stable_mosaic.version = 11 : i64} {
  func.func @_mm_dual_add_relu_kernel(%arg0: i32, %arg1: memref<128x128xbf16, #tpu.memory_space<vmem>>, %arg2: memref<128x128xbf16, #tpu.memory_space<vmem>>, %arg3: memref<128x128xbf16, #tpu.memory_space<vmem>>, %arg4: memref<128x128xbf16, #tpu.memory_space<vmem>>, %arg5: memref<1x128xf32, #tpu.memory_space<vmem>>, %arg6: memref<128x128xf32, #tpu.memory_space<vmem>>) attributes {dimension_semantics = [#tpu.dimension_semantics<parallel>], iteration_bounds = array<i64: 1>, scalar_prefetch = 0 : i64, scratch_operands = 0 : i64, tpu.core_type = #tpu.core_type<tc>, window_params = [{transform_indices = @transform_0, window_bounds = array<i64: 128, 128>}, {pipeline_mode = #tpu.pipeline_mode<synchronous>, transform_indices = @transform_1, window_bounds = array<i64: 128, 128>}, {transform_indices = @transform_2, window_bounds = array<i64: 128, 128>}, {pipeline_mode = #tpu.pipeline_mode<synchronous>, transform_indices = @transform_3, window_bounds = array<i64: 128, 128>}, {pipeline_mode = #tpu.pipeline_mode<synchronous>, transform_indices = @transform_4, window_bounds = array<i64: 1, 128>}, {transform_indices = @transform_5, window_bounds = array<i64: 128, 128>}]} {
    %c0 = arith.constant 0 : index
    %c0_0 = arith.constant 0 : index
    %0 = vector.load %arg1[%c0, %c0_0] : memref<128x128xbf16, #tpu.memory_space<vmem>>, vector<128x128xbf16>
    %c0_1 = arith.constant 0 : index
    %c0_2 = arith.constant 0 : index
    %1 = vector.load %arg2[%c0_1, %c0_2] : memref<128x128xbf16, #tpu.memory_space<vmem>>, vector<128x128xbf16>
    %cst = arith.constant dense<0.000000e+00> : vector<128x128xf32>
    %2 = tpu.matmul %0, %1, %cst {dimension_numbers = #tpu.dot_dimension_numbers<[1], [0], [0], [1], [0, 0, 1, 1], [], []>} : vector<128x128xbf16>, vector<128x128xbf16>, vector<128x128xf32> -> vector<128x128xf32>
    %c0_3 = arith.constant 0 : index
    %c0_4 = arith.constant 0 : index
    %3 = vector.load %arg3[%c0_3, %c0_4] : memref<128x128xbf16, #tpu.memory_space<vmem>>, vector<128x128xbf16>
    %c0_5 = arith.constant 0 : index
    %c0_6 = arith.constant 0 : index
    %4 = vector.load %arg4[%c0_5, %c0_6] : memref<128x128xbf16, #tpu.memory_space<vmem>>, vector<128x128xbf16>
    %cst_7 = arith.constant dense<0.000000e+00> : vector<128x128xf32>
    %5 = tpu.matmul %3, %4, %cst_7 {dimension_numbers = #tpu.dot_dimension_numbers<[1], [0], [0], [1], [0, 0, 1, 1], [], []>} : vector<128x128xbf16>, vector<128x128xbf16>, vector<128x128xf32> -> vector<128x128xf32>
    %6 = arith.addf %2, %5 : vector<128x128xf32>
    %c0_8 = arith.constant 0 : index
    %c0_9 = arith.constant 0 : index
    %7 = vector.load %arg5[%c0_8, %c0_9] : memref<1x128xf32, #tpu.memory_space<vmem>>, vector<1x128xf32>
    %8 = vector.broadcast %7 : vector<1x128xf32> to vector<128x128xf32>
    %9 = arith.addf %6, %8 : vector<128x128xf32>
    %cst_10 = arith.constant 0.000000e+00 : f32
    %10 = vector.broadcast %cst_10 : f32 to vector<128x128xf32>
    %11 = arith.maximumf %9, %10 : vector<128x128xf32>
    %c0_11 = arith.constant 0 : index
    %c0_12 = arith.constant 0 : index
    %12 = vector.load %arg6[%c0_11, %c0_12] : memref<128x128xf32, #tpu.memory_space<vmem>>, vector<128x128xf32>
    tpu.vector_store %arg6[%c0_11, %c0_12], %11 {strides = array<i32>} : memref<128x128xf32, #tpu.memory_space<vmem>>, vector<128x128xf32>,
    return
  }
  func.func @transform_0(%arg0: i32) -> (i32, i32) {
    %c0_i32 = arith.constant 0 : i32
    %c0_i32_0 = arith.constant 0 : i32
    return %arg0, %c0_i32 : i32, i32
  }
  func.func @transform_1(%arg0: i32) -> (i32, i32) {
    %c0_i32 = arith.constant 0 : i32
    %c0_i32_0 = arith.constant 0 : i32
    %c0_i32_1 = arith.constant 0 : i32
    return %c0_i32, %c0_i32_0 : i32, i32
  }
  func.func @transform_2(%arg0: i32) -> (i32, i32) {
    %c0_i32 = arith.constant 0 : i32
    %c0_i32_0 = arith.constant 0 : i32
    return %arg0, %c0_i32 : i32, i32
  }
  func.func @transform_3(%arg0: i32) -> (i32, i32) {
    %c0_i32 = arith.constant 0 : i32
    %c0_i32_0 = arith.constant 0 : i32
    %c0_i32_1 = arith.constant 0 : i32
    return %c0_i32, %c0_i32_0 : i32, i32
  }
  func.func @transform_4(%arg0: i32) -> (i32, i32) {
    %c0_i32 = arith.constant 0 : i32
    %c0_i32_0 = arith.constant 0 : i32
    %c0_i32_1 = arith.constant 0 : i32
    return %c0_i32, %c0_i32_0 : i32, i32
  }
  func.func @transform_5(%arg0: i32) -> (i32, i32) {
    %c0_i32 = arith.constant 0 : i32
    %c0_i32_0 = arith.constant 0 : i32
    return %arg0, %c0_i32 : i32, i32
  }
}

</mosaic_0001>

<bundles_post_ra>
// kernel: bottleneck_forward.3
= control target key start
LH: loop header
LB: loop body
LE: loop exit
PB: predicated region body
PF: predicated region fallthrough
CT: control target
= control target key end

     0   :  { %s1430_s12 = smov 0   ;;  %s1432_s13 = smov 0   ;;  %s1567_s0 = inlined_call_operand.vmem [shape: bf16[512,128], index: 0, kind: input, shape index: {}]   ;;  %s1568_s1 = inlined_call_operand.vmem [shape: bf16[128,128], index: 1, kind: input, shape index: {}]   ;;  %s1569_s2 = inlined_call_operand.vmem [shape: f32[1,128], index: 2, kind: input, shape index: {}]   ;;  %s1570_s3 = inlined_call_operand.vmem [shape: bf16[512,128], index: 3, kind: output, shape index: {}]  }
   0x1   :  { %s1434_s14 = smov 0  }
   0x2 LB: > { %s25_s15 = sadd.s32 1, %s1404_s13  ;;  %p1059_p0 = scmp.ge.s32.totalorder %s1408_s14, 1  ;;  %s1408_s14 = sphi %s1434_s14, %s13_s14   ;;  %s1404_s13 = sphi %s1432_s13, %s1572_s13   ;;  %s1400_s12 = sphi %s1430_s12, %s1571_s12  }
   0x3   : > { %p27_p1 = scmp.ge.s32.totalorder %s25_s15, 2  ;;  %p166_p2 = scmp.lt.s32.totalorder %s1408_s14, 3 }
   0x5   : > { %s1574_s15 = smov (%p27_p1, %s25_s15), 0  ;;  %p167_p3 = pnand %p1059_p0, %p166_p2 }
   0x6   : > { %v1362_v0 = vld [vmem:[%s1568_s1] sm:$0xff] (!%p167_p3)   ;;  %s1060_s18 = sshll.u32 (!%p167_p3), %s1400_s12, 5  ;;  %v1363_v1 = vld [vmem:[%s1568_s1 + $0x8] sm:$0xff] (!%p167_p3)   ;;  %v1364_v2 = vld [vmem:[%s1568_s1 + $0x10] sm:$0xff] (!%p167_p3)  }
   0x7   : > { %170 = sbr.rel (%p167_p3) target bundleno = 285 (0x11d), region = 32  ;;  %p199_p4 = scmp.lt.s32.totalorder (!%p167_p3), %s1060_s18, 63  ;;  %1274 = vmatprep.subr.bf16.mxu0 (!%p167_p3), %v1362_v0  ;;  %1322 = vmatprep.subr.bf16.mxu1 (!%p167_p3), %v1362_v0  ;;  %v1365_v3 = vld [vmem:[%s1568_s1 + $0x18] sm:$0xff] (!%p167_p3)   ;;  %v1366_v6 = vld [vmem:[%s1568_s1 + $0x20] sm:$0xff] (!%p167_p3)   ;;  %v1367_v7 = vld [vmem:[%s1568_s1 + $0x28] sm:$0xff] (!%p167_p3)  }
   0x8   : > { %1275 = vmatpush3.bf16.msra.mxu0 (!%p167_p3), %v1362_v0  ;;  %1330 = vmatpush3.bf16.msra.mxu1 (!%p167_p3), %v1362_v0  ;;  %v1368_v8 = vld [vmem:[%s1568_s1 + $0x30] sm:$0xff] (!%p167_p3)   ;;  %v1369_v9 = vld [vmem:[%s1568_s1 + $0x38] sm:$0xff] (!%p167_p3)   ;;  %v1501_v24 = vld [vmem:[%s1569_s2] ss:$0 sm:$0xff] (!%p167_p3) }
   0x9   : > { %1276 = vmatprep.subr.bf16.mxu0 (!%p167_p3), %v1363_v1  ;;  %1323 = vmatprep.subr.bf16.mxu1 (!%p167_p3), %v1363_v1 }
   0xc   : > { %1277 = vmatpush3.bf16.msra.mxu0 (!%p167_p3), %v1363_v1  ;;  %1331 = vmatpush3.bf16.msra.mxu1 (!%p167_p3), %v1363_v1 }
   0xd   : > { %1278 = vmatprep.subr.bf16.mxu0 (!%p167_p3), %v1364_v2  ;;  %1324 = vmatprep.subr.bf16.mxu1 (!%p167_p3), %v1364_v2 }
   0xe   : > { %s1576_s18 = smov (!%p199_p4, %s1060_s18), 63 }
   0xf   : > { %s1061_s23 = sshll.u32 %s1576_s18, 2 }
  0x10   : > { %s1465_s26 = scalar_lea.vmem %s1567_s0, %s1061_s23  ;;  %1279 = vmatpush3.bf16.msra.mxu0 %v1364_v2  ;;  %1332 = vmatpush3.bf16.msra.mxu1 %v1364_v2  ;;  %s1516_s17 = scalar_lea.vmem %s1570_s3, %s1061_s23 }
  0x11   : > { %v1370_v4 = vld [vmem:[%s1465_s26] sm:$0xff]   ;;  %1280 = vmatprep.subr.bf16.mxu0 %v1365_v3  ;;  %1325 = vmatprep.subr.bf16.mxu1 %v1365_v3  ;;  %v1372_v10 = vld [vmem:[%s1465_s26 + $0x8] sm:$0xff]   ;;  %v1374_v12 = vld [vmem:[%s1465_s26 + $0x10] sm:$0xff]  }
  0x12   : > { %v1371_v5 = vld [vmem:[%s1465_s26 + $0x40] sm:$0xff]   ;;  %1290 = vmatprep.mubr.bf16.mxu0 %v1370_v4  ;;  %v1373_v11 = vld [vmem:[%s1465_s26 + $0x48] sm:$0xff]   ;;  %v1375_v13 = vld [vmem:[%s1465_s26 + $0x50] sm:$0xff]  }
  0x13   : > { %1306 = vmatprep.mubr.bf16.mxu1 %v1371_v5  ;;  %v1376_v14 = vld [vmem:[%s1465_s26 + $0x18] sm:$0xff]   ;;  %v1378_v16 = vld [vmem:[%s1465_s26 + $0x20] sm:$0xff]   ;;  %v1380_v18 = vld [vmem:[%s1465_s26 + $0x28] sm:$0xff]  }
  0x14   : > { %1281 = vmatpush3.bf16.msra.mxu0 %v1365_v3  ;;  %1333 = vmatpush3.bf16.msra.mxu1 %v1365_v3  ;;  %v1377_v15 = vld [vmem:[%s1465_s26 + $0x58] sm:$0xff]   ;;  %v1379_v17 = vld [vmem:[%s1465_s26 + $0x60] sm:$0xff]   ;;  %v1381_v19 = vld [vmem:[%s1465_s26 + $0x68] sm:$0xff]  }
  0x15   : > { %1282 = vmatprep.subr.bf16.mxu0 %v1366_v6  ;;  %1326 = vmatprep.subr.bf16.mxu1 %v1366_v6  ;;  %v1382_v20 = vld [vmem:[%s1465_s26 + $0x30] sm:$0xff]   ;;  %v1384_v22 = vld [vmem:[%s1465_s26 + $0x38] sm:$0xff]  }
  0x16   : > { %v1383_v21 = vld [vmem:[%s1465_s26 + $0x70] sm:$0xff]   ;;  %v1385_v23 = vld [vmem:[%s1465_s26 + $0x78] sm:$0xff]  }
  0x18   : > { %1283 = vmatpush3.bf16.msra.mxu0 %v1366_v6  ;;  %1334 = vmatpush3.bf16.msra.mxu1 %v1366_v6 }
  0x19   : > { %1284 = vmatprep.subr.bf16.mxu0 %v1367_v7  ;;  %1327 = vmatprep.subr.bf16.mxu1 %v1367_v7 }
  0x1c   : > { %1285 = vmatpush3.bf16.msra.mxu0 %v1367_v7  ;;  %1335 = vmatpush3.bf16.msra.mxu1 %v1367_v7 }
  0x1d   : > { %1286 = vmatprep.subr.bf16.mxu0 %v1368_v8  ;;  %1328 = vmatprep.subr.bf16.mxu1 %v1368_v8 }
  0x20   : > { %1287 = vmatpush3.bf16.msra.mxu0 %v1368_v8  ;;  %1336 = vmatpush3.bf16.msra.mxu1 %v1368_v8 }
  0x21   : > { %1288 = vmatprep.subr.bf16.mxu0 %v1369_v9  ;;  %1329 = vmatprep.subr.bf16.mxu1 %v1369_v9 }
  0x24   : > { %1289 = vmatpush3.bf16.msra.mxu0 %v1369_v9  ;;  %1337 = vmatpush3.bf16.msra.mxu1 %v1369_v9 }
  0x27   : > { %1291 = vmatmul.mubr.bf16.vlgmr.msra.gmra.mrb[0].mxu0 %v1372_v10  ;;  %1307 = vmatmul.mubr.bf16.vlgmr.msra.gmra.mrb[0].mxu1 %v1373_v11 }
  0x28   : > { %1294 = vmatprep.mubr.bf16.mxu0 %v1374_v12  ;;  %1310 = vmatprep.mubr.bf16.mxu1 %v1375_v13 }
  0x2f   : > { %1295 = vmatmul.mubr.bf16.gmra.mrb[4].mxu0 %v1376_v14  ;;  %1311 = vmatmul.mubr.bf16.gmra.mrb[4].mxu1 %v1377_v15 }
  0x30   : > { %1298 = vmatprep.mubr.bf16.mxu0 %v1378_v16  ;;  %1314 = vmatprep.mubr.bf16.mxu1 %v1379_v17 }
  0x37   : > { %1299 = vmatmul.mubr.bf16.gmra.mrb[8].mxu0 %v1380_v18  ;;  %1315 = vmatmul.mubr.bf16.gmra.mrb[8].mxu1 %v1381_v19 }
  0x38   : > { %1302 = vmatprep.mubr.bf16.mxu0 %v1382_v20  ;;  %1318 = vmatprep.mubr.bf16.mxu1 %v1383_v21 }
  0x3f   : > { %1303 = vmatmul.mubr.bf16.gmra.mrb[12].mxu0 %v1384_v22  ;;  %1319 = vmatmul.mubr.bf16.gmra.mrb[12].mxu1 %v1385_v23 }
  0xfa   : > { %v1292_v25 = vpop.f32.mrb[0].mxu0  ;;  %v1308_v26 = vpop.f32.mrb[0].mxu1 }
  0xfb   : > { %v749_v27 = vadd.f32 %v1292_v25, %v1501_v24  ;;  %v765_v28 = vadd.f32 %v1308_v26, %v1501_v24  ;;  %v514_v29 = vpop.f32.mrb[1].mxu0  ;;  %v578_v30 = vpop.f32.mrb[1].mxu1 }
  0xfc   : > { %v747_v31 = vadd.f32 %v1501_v24, %v514_v29  ;;  %v763_v32 = vadd.f32 %v1501_v24, %v578_v30  ;;  %v1293_v33 = vpop.f32.mrb[2].mxu0  ;;  %v1309_v34 = vpop.f32.mrb[2].mxu1 }
  0xfd   : > { %v750_v35 = vadd.f32 %v1293_v33, %v1501_v24  ;;  %v766_v36 = vadd.f32 %v1309_v34, %v1501_v24  ;;  %v517_v37 = vpop.f32.mrb[3].mxu0  ;;  %v581_v38 = vpop.f32.mrb[3].mxu1  ;;  %v781_v41 = vmax.f32 %v749_v27, 0.0  ;;  %v797_v42 = vmax.f32 %v765_v28, 0.0 }
  0xfe   : > { %v748_v39 = vadd.f32 %v1501_v24, %v517_v37  ;;  %v764_v40 = vadd.f32 %v1501_v24, %v581_v38  ;;  %v779_v45 = vmax.f32 %v747_v31, 0.0  ;;  %v795_v46 = vmax.f32 %v763_v32, 0.0 }
  0xff   : > { %v782_v43 = vmax.f32 %v750_v35, 0.0  ;;  %v798_v44 = vmax.f32 %v766_v36, 0.0 }
 0x100   : > { %v780_v47 = vmax.f32 %v748_v39, 0.0  ;;  %v796_v48 = vmax.f32 %v764_v40, 0.0 }
 0x101   : > { %v1163_v49 = vpack.c.bf16 %v782_v43, %v781_v41  ;;  %v1203_v50 = vpack.c.bf16 %v798_v44, %v797_v42 }
 0x102   : > { %v1158_v51 = vpack.c.bf16 %v780_v47, %v779_v45  ;;  %v1198_v52 = vpack.c.bf16 %v796_v48, %v795_v46  ;;  %v1296_v53 = vpop.f32.mrb[4].mxu0  ;;  %v1312_v54 = vpop.f32.mrb[4].mxu1 }
 0x103   : > { %1235 = vst [vmem:[%s1516_s17 + $0x8] sm:$0xff] %v1163_v49   ;;  %1243 = vst [vmem:[%s1516_s17 + $0x48] sm:$0xff] %v1203_v50   ;;  %v753_v55 = vadd.f32 %v1296_v53, %v1501_v24  ;;  %v769_v56 = vadd.f32 %v1312_v54, %v1501_v24  ;;  %v530_v57 = vpop.f32.mrb[5].mxu0  ;;  %v594_v58 = vpop.f32.mrb[5].mxu1 }
 0x104   : > { %1159 = vst [vmem:[%s1516_s17] sm:$0xff] %v1158_v51   ;;  %1242 = vst [vmem:[%s1516_s17 + $0x40] sm:$0xff] %v1198_v52   ;;  %v751_v59 = vadd.f32 %v1501_v24, %v530_v57  ;;  %v767_v60 = vadd.f32 %v1501_v24, %v594_v58  ;;  %v1297_v61 = vpop.f32.mrb[6].mxu0  ;;  %v1313_v62 = vpop.f32.mrb[6].mxu1 }
 0x105   : > { %v754_v63 = vadd.f32 %v1297_v61, %v1501_v24  ;;  %v770_v0 = vadd.f32 %v1313_v62, %v1501_v24  ;;  %v533_v1 = vpop.f32.mrb[7].mxu0  ;;  %v597_v2 = vpop.f32.mrb[7].mxu1  ;;  %v785_v5 = vmax.f32 %v753_v55, 0.0  ;;  %v801_v6 = vmax.f32 %v769_v56, 0.0 }
 0x106   : > { %v752_v3 = vadd.f32 %v1501_v24, %v533_v1  ;;  %v768_v4 = vadd.f32 %v1501_v24, %v597_v2  ;;  %v783_v9 = vmax.f32 %v751_v59, 0.0  ;;  %v799_v10 = vmax.f32 %v767_v60, 0.0 }
 0x107   : > { %v786_v7 = vmax.f32 %v754_v63, 0.0  ;;  %v802_v8 = vmax.f32 %v770_v0, 0.0 }
 0x108   : > { %v784_v11 = vmax.f32 %v752_v3, 0.0  ;;  %v800_v12 = vmax.f32 %v768_v4, 0.0 }
 0x109   : > { %v1173_v13 = vpack.c.bf16 %v786_v7, %v785_v5  ;;  %v1213_v14 = vpack.c.bf16 %v802_v8, %v801_v6 }
 0x10a   : > { %v1168_v15 = vpack.c.bf16 %v784_v11, %v783_v9  ;;  %v1208_v16 = vpack.c.bf16 %v800_v12, %v799_v10  ;;  %v1300_v17 = vpop.f32.mrb[8].mxu0  ;;  %v1316_v18 = vpop.f32.mrb[8].mxu1 }
 0x10b   : > { %1237 = vst [vmem:[%s1516_s17 + $0x18] sm:$0xff] %v1173_v13   ;;  %1245 = vst [vmem:[%s1516_s17 + $0x58] sm:$0xff] %v1213_v14   ;;  %v757_v19 = vadd.f32 %v1300_v17, %v1501_v24  ;;  %v773_v20 = vadd.f32 %v1316_v18, %v1501_v24  ;;  %v546_v21 = vpop.f32.mrb[9].mxu0  ;;  %v610_v22 = vpop.f32.mrb[9].mxu1 }
 0x10c   : > { %1236 = vst [vmem:[%s1516_s17 + $0x10] sm:$0xff] %v1168_v15   ;;  %1244 = vst [vmem:[%s1516_s17 + $0x50] sm:$0xff] %v1208_v16   ;;  %v755_v23 = vadd.f32 %v1501_v24, %v546_v21  ;;  %v771_v25 = vadd.f32 %v1501_v24, %v610_v22  ;;  %v1301_v26 = vpop.f32.mrb[10].mxu0  ;;  %v1317_v27 = vpop.f32.mrb[10].mxu1 }
 0x10d   : > { %v758_v28 = vadd.f32 %v1301_v26, %v1501_v24  ;;  %v774_v29 = vadd.f32 %v1317_v27, %v1501_v24  ;;  %v549_v30 = vpop.f32.mrb[11].mxu0  ;;  %v613_v31 = vpop.f32.mrb[11].mxu1  ;;  %v789_v34 = vmax.f32 %v757_v19, 0.0  ;;  %v805_v35 = vmax.f32 %v773_v20, 0.0 }
 0x10e   : > { %v756_v32 = vadd.f32 %v1501_v24, %v549_v30  ;;  %v772_v33 = vadd.f32 %v1501_v24, %v613_v31  ;;  %v787_v38 = vmax.f32 %v755_v23, 0.0  ;;  %v803_v39 = vmax.f32 %v771_v25, 0.0 }
 0x10f   : > { %v790_v36 = vmax.f32 %v758_v28, 0.0  ;;  %v806_v37 = vmax.f32 %v774_v29, 0.0 }
 0x110   : > { %v788_v40 = vmax.f32 %v756_v32, 0.0  ;;  %v804_v41 = vmax.f32 %v772_v33, 0.0 }
 0x111   : > { %v1183_v42 = vpack.c.bf16 %v790_v36, %v789_v34  ;;  %v1223_v43 = vpack.c.bf16 %v806_v37, %v805_v35 }
 0x112   : > { %v1178_v44 = vpack.c.bf16 %v788_v40, %v787_v38  ;;  %v1218_v45 = vpack.c.bf16 %v804_v41, %v803_v39  ;;  %v1304_v46 = vpop.f32.mrb[12].mxu0  ;;  %v1320_v47 = vpop.f32.mrb[12].mxu1 }
 0x113   : > { %1239 = vst [vmem:[%s1516_s17 + $0x28] sm:$0xff] %v1183_v42   ;;  %1247 = vst [vmem:[%s1516_s17 + $0x68] sm:$0xff] %v1223_v43   ;;  %v761_v48 = vadd.f32 %v1304_v46, %v1501_v24  ;;  %v777_v49 = vadd.f32 %v1320_v47, %v1501_v24  ;;  %v562_v50 = vpop.f32.mrb[13].mxu0  ;;  %v626_v51 = vpop.f32.mrb[13].mxu1 }
 0x114   : > { %1238 = vst [vmem:[%s1516_s17 + $0x20] sm:$0xff] %v1178_v44   ;;  %1246 = vst [vmem:[%s1516_s17 + $0x60] sm:$0xff] %v1218_v45   ;;  %v759_v52 = vadd.f32 %v1501_v24, %v562_v50  ;;  %v775_v53 = vadd.f32 %v1501_v24, %v626_v51  ;;  %v1305_v54 = vpop.f32.mrb[14].mxu0  ;;  %v1321_v55 = vpop.f32.mrb[14].mxu1 }
 0x115   : > { %v762_v56 = vadd.f32 %v1305_v54, %v1501_v24  ;;  %v778_v57 = vadd.f32 %v1321_v55, %v1501_v24  ;;  %v565_v58 = vpop.f32.mrb[15].mxu0  ;;  %v629_v59 = vpop.f32.mrb[15].mxu1  ;;  %v793_v62 = vmax.f32 %v761_v48, 0.0  ;;  %v809_v63 = vmax.f32 %v777_v49, 0.0 }
 0x116   : > { %v760_v60 = vadd.f32 %v1501_v24, %v565_v58  ;;  %v776_v61 = vadd.f32 %v1501_v24, %v629_v59  ;;  %v791_v2 = vmax.f32 %v759_v52, 0.0  ;;  %v807_v3 = vmax.f32 %v775_v53, 0.0 }
 0x117   : > { %v794_v0 = vmax.f32 %v762_v56, 0.0  ;;  %v810_v1 = vmax.f32 %v778_v57, 0.0 }
 0x118   : > { %v792_v4 = vmax.f32 %v760_v60, 0.0  ;;  %v808_v5 = vmax.f32 %v776_v61, 0.0 }
 0x119   : > { %v1193_v6 = vpack.c.bf16 %v794_v0, %v793_v62  ;;  %v1233_v7 = vpack.c.bf16 %v810_v1, %v809_v63 }
 0x11a   : > { %v1188_v8 = vpack.c.bf16 %v792_v4, %v791_v2  ;;  %v1228_v9 = vpack.c.bf16 %v808_v5, %v807_v3 }
 0x11b   : > { %1241 = vst [vmem:[%s1516_s17 + $0x38] sm:$0xff] %v1193_v6   ;;  %1249 = vst [vmem:[%s1516_s17 + $0x78] sm:$0xff] %v1233_v7  }
 0x11c   : > { %1240 = vst [vmem:[%s1516_s17 + $0x30] sm:$0xff] %v1188_v8   ;;  %1248 = vst [vmem:[%s1516_s17 + $0x70] sm:$0xff] %v1228_v9  }
 0x11d PF: > { %s13_s14 = sadd.s32 1, %s1408_s14   ;;  %s1571_s12 = smov %s1404_s13 }
 0x11e   : > { %p10_p5 = scmp.ge.s32.totalorder %s13_s14, 4   ;;  %s1572_s13 = smov %s1574_s15 }
 0x120   :  { %12 = sbr.rel (!%p10_p5) target bundleno = 2 (0x2), region = 73 }

// kernel: bottleneck_forward.4
= control target key start
LH: loop header
LB: loop body
LE: loop exit
PB: predicated region body
PF: predicated region fallthrough
CT: control target
= control target key end

     0   :  { %s2778_s12 = smov 0   ;;  %s3458_s0 = inlined_call_operand.vmem [shape: f32[2,88,512], index: 0, kind: input, shape index: {}]   ;;  %s3459_s1 = inlined_call_operand.vmem [shape: bf16[1152,128], index: 1, kind: input, shape index: {}]   ;;  %s3460_s2 = inlined_call_operand.vmem [shape: f32[1,128], index: 2, kind: input, shape index: {}]   ;;  %s3461_s3 = inlined_call_operand.vmem [shape: bf16[2,72,128], index: 3, kind: output, shape index: {}]  }
   0x1 LB: > { %s2084_s13 = sadd.s32 4294967295, %s2754_s12   ;;  %p2088_p0 = scmp.ge.s32.totalorder %s2754_s12, 1  ;;  %s2754_s12 = sphi %s2778_s12, %s13_s12  }
   0x2   : > { %p137_p1 = scmp.lt.s32.totalorder %s2754_s12, 3 }
   0x4   : > { %p138_p2 = pnand %p2088_p0, %p137_p1 }
   0x5   : > { %v2676_v0 = vld [vmem:[%s3459_s1] sm:$0xff] (!%p138_p2)   ;;  %v2756_v1 = vmov (!%p138_p2), 0.0   ;;  %v2678_v3 = vld [vmem:[%s3459_s1 + $0x8] sm:$0xff] (!%p138_p2)   ;;  %vm2757_vm0 = vmmov (!%p138_p2), 0   ;;  %v2680_v5 = vld [vmem:[%s3459_s1 + $0x10] sm:$0xff] (!%p138_p2)   ;;  %p161_p3 = scmp.lt.s32.totalorder (!%p138_p2), %s2084_s13, 1 }
   0x6   : > { %141 = sbr.rel (%p138_p2) target bundleno = 437 (0x1b5), region = 32  ;;  %2324 = vmatprep.subr.bf16.mxu0 (!%p138_p2), %v2756_v1  ;;  %2360 = vmatprep.subr.bf16.mxu1 (!%p138_p2), %v2756_v1  ;;  %v2677_v2 = vld [vmem:[%s3459_s1 + $0x40] sm:$0xff] (!%p138_p2)   ;;  %v2679_v4 = vld [vmem:[%s3459_s1 + $0x48] sm:$0xff] (!%p138_p2)   ;;  %v2681_v6 = vld [vmem:[%s3459_s1 + $0x50] sm:$0xff] (!%p138_p2)   ;;  %vm539_vm1 = vsmask.f32 (!%p138_p2), 7424 }
   0x7   : > { %2325 = vmatpush3.bf16.msra.mxu0 (!%p138_p2), %v2676_v0  ;;  %2340 = vmatprep.mubr.msk.bf16.mxu0 (!%p138_p2), %vm2757_vm0, %v2756_v1  ;;  %v2682_v7 = vld [vmem:[%s3459_s1 + $0x18] sm:$0xff] (!%p138_p2)   ;;  %v2684_v9 = vld [vmem:[%s3459_s1 + $0x20] sm:$0xff] (!%p138_p2)   ;;  %v2686_v11 = vld [vmem:[%s3459_s1 + $0x28] sm:$0xff] (!%p138_p2)   ;;  %vm1787_vm2 = vcmask (!%p138_p2), 1046528  }
   0x8   : > { %2361 = vmatpush3.bf16.msra.mxu1 (!%p138_p2), %v2677_v2  ;;  %2326 = vmatprep.subr.bf16.mxu0 (!%p138_p2), %v2756_v1  ;;  %v2683_v8 = vld [vmem:[%s3459_s1 + $0x58] sm:$0xff] (!%p138_p2)   ;;  %v2685_v10 = vld [vmem:[%s3459_s1 + $0x60] sm:$0xff] (!%p138_p2)   ;;  %v2687_v12 = vld [vmem:[%s3459_s1 + $0x68] sm:$0xff] (!%p138_p2)  }
   0x9   : > { %2362 = vmatprep.subr.bf16.mxu1 (!%p138_p2), %v2756_v1  ;;  %2376 = vmatprep.mubr.msk.bf16.mxu1 (!%p138_p2), %vm2757_vm0, %v2756_v1  ;;  %v2688_v13 = vld [vmem:[%s3459_s1 + $0x30] sm:$0xff] (!%p138_p2)   ;;  %v2690_v17 = vld [vmem:[%s3459_s1 + $0x38] sm:$0xff] (!%p138_p2)   ;;  %v2692_v27 = vld [vmem:[%s3459_s1 + $0x80] sm:$0xff] (!%p138_p2)  }
   0xa   : > { %v2689_v14 = vld [vmem:[%s3459_s1 + $0x70] sm:$0xff] (!%p138_p2)   ;;  %v2691_v26 = vld [vmem:[%s3459_s1 + $0x78] sm:$0xff] (!%p138_p2)   ;;  %v2693_v39 = vld [vmem:[%s3459_s1 + $0x88] sm:$0xff] (!%p138_p2)  }
   0xb   : > { %2327 = vmatpush3.bf16.msra.mxu0 (!%p138_p2), %v2678_v3  ;;  %v2694_v41 = vld [vmem:[%s3459_s1 + $0xc0] sm:$0xff] (!%p138_p2)   ;;  %v2696_v44 = vld [vmem:[%s3459_s1 + $0xc8] sm:$0xff] (!%p138_p2)   ;;  %v2695_v61 = vld [vmem:[%s3459_s1 + $0x90] sm:$0xff] (!%p138_p2)  }
   0xc   : > { %2363 = vmatpush3.bf16.msra.mxu1 (!%p138_p2), %v2679_v4  ;;  %2328 = vmatprep.subr.bf16.mxu0 (!%p138_p2), %v2756_v1  ;;  %v2698_v4 = vld [vmem:[%s3459_s1 + $0xd0] sm:$0xff] (!%p138_p2)  }
   0xd   : > { %2364 = vmatprep.subr.bf16.mxu1 %v2756_v1  ;;  %s3463_s13 = smov (!%p161_p3, %s2084_s13), 1 }
   0xe   : > { %s2664_s7 = smul.u32 352, %s3463_s13 }
   0xf   : > { %2329 = vmatpush3.bf16.msra.mxu0 %v2680_v5  ;;  %s2665_s17 = smul.u32 36, %s3463_s13 }
  0x10   : > { %2365 = vmatpush3.bf16.msra.mxu1 %v2681_v6  ;;  %2330 = vmatprep.subr.bf16.mxu0 %v2756_v1  ;;  %s2851_s18 = scalar_lea.vmem %s3458_s0, %s2664_s7 }
  0x11   : > { %2366 = vmatprep.subr.bf16.mxu1 %v2756_v1  ;;  %v175_v15 = vld [vmem:[%s2851_s18 + $0x60] sm:$0xff]  ;;  %v2870_v20 = vld [vmem:[%s2851_s18 + $0x68] sm:$0xff]  ;;  %s3444_s21 = scalar_lea.vmem %s3461_s3, %s2665_s17 }
  0x12   : > { %v2859_v16 = vld [vmem:[%s2851_s18 + $0x80] sm:$0xff]  ;;  %v2873_v21 = vld [vmem:[%s2851_s18 + $0x88] sm:$0xff] }
  0x13   : > { %2331 = vmatpush3.bf16.msra.mxu0 %v2682_v7  ;;  %v172_v18 = vld [vmem:[%s2851_s18] sm:$0xff]  ;;  %v1318_v22 = vpack.c.bf16 %v2859_v16, %v175_v15  ;;  %v331_v23 = vld [vmem:[%s2851_s18 + $0x8] sm:$0xff]  ;;  %v1540_v24 = vpack.c.bf16 %v2873_v21, %v2870_v20  ;;  %v2697_v7 = vld [vmem:[%s3459_s1 + $0x98] sm:$0xff]  }
  0x14   : > { %2367 = vmatpush3.bf16.msra.mxu1 %v2683_v8  ;;  %2332 = vmatprep.subr.bf16.mxu0 %v2756_v1  ;;  %v2867_v19 = vld [vmem:[%s2851_s18 + $0x20] sm:$0xff]  ;;  %v332_v25 = vld [vmem:[%s2851_s18 + $0x28] sm:$0xff] }
  0x15   : > { %2368 = vmatprep.subr.bf16.mxu1 %v2756_v1  ;;  %v2889_v28 = vld [vmem:[%s2851_s18 + $0xa0] sm:$0xff]  ;;  %v1346_v29 = vshll.u32 %v1318_v22, 16  ;;  %v181_v30 = vpack.c.bf16 %v2867_v19, %v172_v18  ;;  %v340_v31 = vpack.c.bf16 %v332_v25, %v331_v23  ;;  %v2893_v32 = vld [vmem:[%s2851_s18 + $0xa8] sm:$0xff]  ;;  %v1568_v35 = vshll.u32 %v1540_v24, 16  ;;  %v2704_v25 = vld [vmem:[%s3459_s1 + $0xb0] sm:$0xff]  }
  0x16   : > { %v2896_v33 = vld [vmem:[%s2851_s18 + $0xc0] sm:$0xff]  ;;  %v2899_v34 = vld [vmem:[%s2851_s18 + $0xc8] sm:$0xff]  ;;  %v1350_v37 = vshrl.u32 %v1318_v22, 16  ;;  %v1572_v50 = vshrl.u32 %v1540_v24, 16 }
  0x17   : > { %2333 = vmatpush3.bf16.msra.mxu0 %v2684_v9  ;;  %v1319_v36 = vpack.c.bf16 %v2896_v33, %v2889_v28  ;;  %v1541_v38 = vpack.c.bf16 %v2899_v34, %v2893_v32  ;;  %v2910_v40 = vld [vmem:[%s2851_s18 + $0x40] sm:$0xff]  ;;  %v2916_v42 = vrot.slane %v1346_v29, 1  ;;  %v2919_v43 = vld [vmem:[%s2851_s18 + $0x48] sm:$0xff]  ;;  %v2930_v47 = vrot.slane %v1568_v35, 1 }
  0x18   : > { %2369 = vmatpush3.bf16.msra.mxu1 %v2685_v10  ;;  %2334 = vmatprep.subr.bf16.mxu0 %v2756_v1  ;;  %v2925_v45 = vld [vmem:[%s2851_s18 + $0xe0] sm:$0xff]  ;;  %v2937_v51 = vld [vmem:[%s2851_s18 + $0xe8] sm:$0xff]  ;;  %v2950_v57 = vpack.c.bf16 %v175_v15, %v2910_v40  ;;  %v341_v60 = vpack.c.bf16 %v2870_v20, %v2919_v43 }
  0x19   : > { %2370 = vmatprep.subr.bf16.mxu1 %v2756_v1  ;;  %v2928_v46 = vld [vmem:[%s2851_s18 + $0x100] sm:$0xff]  ;;  %v1352_v48 = vor.u32 %v1350_v37, %v2916_v42  ;;  %v1354_v49 = vshll.u32 %v1319_v36, 16  ;;  %v1576_v52 = vshll.u32 %v1541_v38, 16  ;;  %v2946_v54 = vld [vmem:[%s2851_s18 + $0x108] sm:$0xff]  ;;  %v1574_v56 = vor.u32 %v1572_v50, %v2930_v47  ;;  %v3069_v37 = vld [vmem:[%s2851_s18 + $0x30] sm:$0xff] }
  0x1a   : > { %v2941_v53 = vpack.c.bf16 %v2928_v46, %v2925_v45  ;;  %v2955_v59 = vpack.c.bf16 %v2946_v54, %v2937_v51  ;;  %v1358_v63 = vshrl.u32 %v1319_v36, 16  ;;  %v1580_v3 = vshrl.u32 %v1541_v38, 16  ;;  %v2699_v15 = vld [vmem:[%s3459_s1 + $0xa0] sm:$0xff]   ;;  %v2702_v18 = vld [vmem:[%s3459_s1 + $0xa8] sm:$0xff]   ;;  %v731_v36 = vld [vmem:[%s2851_s18 + $0x10] sm:$0xff] }
  0x1b   : > { %2335 = vmatpush3.bf16.msra.mxu0 %v2686_v11  ;;  %v1356_v55 = vrot.slane %v1354_v49, 1  ;;  %v1578_v58 = vrot.slane %v1576_v52, 1  ;;  %v2700_v11 = vld [vmem:[%s3459_s1 + $0xd8] sm:$0xff]   ;;  %v508_v20 = vld [vmem:[%s2851_s18] sm:$0xfe]  ;;  %v3029_v22 = vpack.c.bf16 %v2925_v45, %v2896_v33  ;;  %v343_v24 = vpack.c.bf16 %v2937_v51, %v2899_v34  ;;  %v2709_v49 = vld [vmem:[%s3459_s1 + $0x108] sm:$0xff]  }
  0x1c   : > { %2371 = vmatpush3.bf16.msra.mxu1 %v2687_v12  ;;  %2336 = vmatprep.subr.bf16.mxu0 %v2756_v1  ;;  %v1362_v0 = vshll.u32 %v2941_v53, 16  ;;  %v1584_v9 = vshll.u32 %v2955_v59, 16  ;;  %v2995_v12 = vpack.c.bf16 %v2889_v28, %v2859_v16  ;;  %v2701_v16 = vld [vmem:[%s3459_s1 + $0xe0] sm:$0xff]   ;;  %v518_v23 = vpack.c.bf16 %v2867_v19, %v508_v20  ;;  %v2707_v28 = vld [vmem:[%s3459_s1 + $0xf8] sm:$0xff]   ;;  %v733_v52 = vld [vmem:[%s2851_s18 + $0x50] sm:$0xff] }
  0x1d   : > { %2372 = vmatprep.subr.bf16.mxu1 %v2756_v1  ;;  %v2963_v62 = vsel %vm539_vm1, %v1352_v48, %v1356_v55  ;;  %v2968_v2 = vsel %vm539_vm1, %v1574_v56, %v1578_v58  ;;  %v1360_v5 = vor.u32 %v1358_v63, %v1356_v55  ;;  %v1582_v10 = vor.u32 %v1580_v3, %v1578_v58  ;;  %v2710_v48 = vld [vmem:[%s3459_s1 + $0x140] sm:$0xff]   ;;  %v2712_v55 = vld [vmem:[%s3459_s1 + $0x148] sm:$0xff]   ;;  %v2714_v3 = vld [vmem:[%s3459_s1 + $0x150] sm:$0xff]  }
  0x1e   : > { %v2973_v6 = vrot.slane %v1362_v0, 1  ;;  %v543_v19 = vshll.u32 %v518_v23, 16  ;;  %v185_v29 = vpack.c.bf16 %v2928_v46, %v2928_v46  ;;  %v344_v33 = vpack.c.bf16 %v2946_v54, %v2946_v54  ;;  %v734_v54 = vld [vmem:[%s2851_s18 + $0x70] sm:$0xff] }
  0x1f   : > { %2337 = vmatpush3.bf16.msra.mxu0 %v2688_v13  ;;  %v2998_v13 = vrot.slane %v1584_v9, 1  ;;  %v552_v38 = vshrl.u32 %v2950_v57, 16  ;;  %v556_v45 = vshll.u32 %v2995_v12, 16  ;;  %v560_v56 = vshrl.u32 %v2995_v12, 16 }
  0x20   : > { %2373 = vmatpush3.bf16.msra.mxu1 %v2689_v14  ;;  %2338 = vmatprep.subr.bf16.mxu0 %v2756_v1  ;;  %v2982_v8 = vsel %vm539_vm1, %v1360_v5, %v2973_v6  ;;  %v342_v14 = vpack.c.bf16 %v2893_v32, %v2873_v21  ;;  %v2703_v21 = vld [vmem:[%s3459_s1 + $0xe8] sm:$0xff]   ;;  %v548_v32 = vshll.u32 %v2950_v57, 16  ;;  %v564_v58 = vshll.u32 %v3029_v22, 16 }
  0x21   : > { %2374 = vmatprep.subr.bf16.mxu1 %v2756_v1  ;;  %v558_v51 = vrot.slane %v556_v45, 1  ;;  %v3103_v0 = vpack.c.bf16 %v734_v54, %v733_v52  ;;  %v2719_v54 = vld [vmem:[%s3459_s1 + $0x168] sm:$0xff]  }
  0x22   : > { %v550_v35 = vrot.slane %v548_v32, 1 }
  0x23   : > { %2339 = vmatpush3.bf16.msra.mxu0 %v2690_v17  ;;  %v3008_v17 = vsel %vm539_vm1, %v1582_v10, %v2998_v13 }
  0x24   : > { %2375 = vmatpush3.bf16.msra.mxu1 %v2691_v26  ;;  %2396 = vmatprep.subr.bf16.mxu0 %v2756_v1  ;;  %v2705_v26 = vld [vmem:[%s3459_s1 + $0xf0] sm:$0xff]   ;;  %v554_v50 = vor.u32 %v552_v38, %v550_v35 }
  0x25   : > { %2432 = vmatprep.subr.bf16.mxu1 %v2756_v1 }
  0x26   : > { %2341 = vmatmul.mubr.bf16.vlgmr.msra.gmra.mrb[0].mxu0 %v181_v30  ;;  %v541_v30 = vshrl.u32 %v518_v23, 16  ;;  %v559_v63 = vsel %vm539_vm1, %v554_v50, %v558_v51  ;;  %v738_v50 = vld [vmem:[%s2851_s18 + $0xf0] sm:$0xff] }
  0x27   : > { %2377 = vmatmul.mubr.bf16.vlgmr.msra.gmra.mrb[0].mxu1 %v340_v31  ;;  %2397 = vmatpush3.bf16.msra.mxu0 %v2692_v27  ;;  %v2706_v27 = vld [vmem:[%s3459_s1 + $0xb8] sm:$0xff]   ;;  %v545_v31 = vrot.slane %v543_v19, 1 }
  0x28   : > { %2398 = vmatprep.subr.bf16.mxu0 %v2756_v1  ;;  %2344 = vmatprep.mubr.msk.bf16.mxu0 %vm2757_vm0, %v2756_v1 }
  0x29   : > { %2380 = vmatprep.mubr.msk.bf16.mxu1 %vm2757_vm0, %v2756_v1  ;;  %2433 = vmatpush3.bf16.msra.mxu1 %v2694_v41  ;;  %v546_v34 = vor.u32 %v545_v31, %v541_v30  ;;  %v740_v41 = vpack.c.bf16 %v3069_v37, %v731_v36  ;;  %v1538_v30 = vld [vmem:[%s2851_s18 + $0x148] sm:$0x1]  ;;  %v568_v31 = vshrl.u32 %v3029_v22, 16 }
  0x2a   : > { %2434 = vmatprep.subr.bf16.mxu1 %v2756_v1 }
  0x2b   : > { %2399 = vmatpush3.bf16.msra.mxu0 %v2693_v39  ;;  %v551_v39 = vsel %vm539_vm1, %v546_v34, %v550_v35  ;;  %v2715_v34 = vld [vmem:[%s3459_s1 + $0x120] sm:$0xff]  }
  0x2c   : > { %2400 = vmatprep.subr.bf16.mxu0 %v2756_v1 }
  0x2d   : > { %2435 = vmatpush3.bf16.msra.mxu1 %v2696_v44  ;;  %v2708_v44 = vld [vmem:[%s3459_s1 + $0x100] sm:$0xff]  }
  0x2e   : > { %2345 = vmatmul.mubr.bf16.gmra.mrb[4].mxu0 %v2950_v57  ;;  %2436 = vmatprep.subr.bf16.mxu1 %v2756_v1  ;;  %v2711_v57 = vld [vmem:[%s3459_s1 + $0x110] sm:$0xff]  }
  0x2f   : > { %2381 = vmatmul.mubr.bf16.gmra.mrb[4].mxu1 %v341_v60  ;;  %2401 = vmatpush3.bf16.msra.mxu0 %v2695_v61  ;;  %v1307_v60 = vld [vmem:[%s2851_s18 + $0x20] sm:$0xfe]  ;;  %v1529_v61 = vld [vmem:[%s2851_s18 + $0x28] sm:$0xfe] }
  0x30   : > { %2348 = vmatprep.mubr.msk.bf16.mxu0 %vm2757_vm0, %v2756_v1  ;;  %2384 = vmatprep.mubr.msk.bf16.mxu1 %vm2757_vm0, %v2756_v1  ;;  %v1539_v5 = vpack.c.bf16 %v2919_v43, %v1529_v61  ;;  %v2716_v43 = vld [vmem:[%s3459_s1 + $0x158] sm:$0xff]   ;;  %v2721_v61 = vld [vmem:[%s3459_s1 + $0x170] sm:$0xff]  }
  0x31   : > { %2402 = vmatprep.subr.bf16.mxu0 %v2756_v1  ;;  %2437 = vmatpush3.bf16.msra.mxu1 %v2698_v4  ;;  %v1317_v4 = vpack.c.bf16 %v2910_v40, %v1307_v60  ;;  %v2713_v40 = vld [vmem:[%s3459_s1 + $0x118] sm:$0xff]  }
  0x32   : > { %2438 = vmatprep.subr.bf16.mxu1 %v2756_v1 }
  0x33   : > { %2403 = vmatpush3.bf16.msra.mxu0 %v2697_v7  ;;  %v517_v7 = vld [vmem:[%s2851_s18 + $0x120] sm:$0x1]  ;;  %v1339_v9 = vshrl.u32 %v1317_v4, 16  ;;  %v1341_v10 = vshll.u32 %v1317_v4, 16 }
  0x34   : > { %2404 = vmatprep.subr.bf16.mxu0 %v2756_v1  ;;  %v3123_v20 = vpack.c.bf16 %v517_v7, %v2928_v46 }
  0x35   : > { %2439 = vmatpush3.bf16.msra.mxu1 %v2700_v11  ;;  %v1561_v11 = vshrl.u32 %v1539_v5, 16 }
  0x36   : > { %2349 = vmatmul.mubr.bf16.gmra.mrb[8].mxu0 %v2995_v12  ;;  %2440 = vmatprep.subr.bf16.mxu1 %v2756_v1  ;;  %v1563_v12 = vshll.u32 %v1539_v5, 16  ;;  %v572_v35 = vshll.u32 %v3123_v20, 16  ;;  %v2723_v5 = vld [vmem:[%s3459_s1 + $0x178] sm:$0xff]  }
  0x37   : > { %2385 = vmatmul.mubr.bf16.gmra.mrb[8].mxu1 %v342_v14  ;;  %2405 = vmatpush3.bf16.msra.mxu0 %v2699_v15  ;;  %v562_v14 = vor.u32 %v560_v56, %v558_v51  ;;  %v566_v15 = vrot.slane %v564_v58, 1  ;;  %v2720_v58 = vld [vmem:[%s3459_s1 + $0x130] sm:$0xff]  }
  0x38   : > { %2352 = vmatprep.mubr.msk.bf16.mxu0 %vm2757_vm0, %v2756_v1  ;;  %2388 = vmatprep.mubr.msk.bf16.mxu1 %vm2757_vm0, %v2756_v1  ;;  %v1565_v23 = vrot.slane %v1563_v12, 1  ;;  %v574_v45 = vrot.slane %v572_v35, 1  ;;  %v1124_v12 = vshll.u32 %v3103_v0, 16 }
  0x39   : > { %2406 = vmatprep.subr.bf16.mxu0 %v2756_v1  ;;  %2441 = vmatpush3.bf16.msra.mxu1 %v2701_v16  ;;  %v735_v16 = vld [vmem:[%s2851_s18 + $0x90] sm:$0xff] }
  0x3a   : > { %2442 = vmatprep.subr.bf16.mxu1 %v2756_v1 }
  0x3b   : > { %2407 = vmatpush3.bf16.msra.mxu0 %v2702_v18  ;;  %v736_v18 = vld [vmem:[%s2851_s18 + $0xb0] sm:$0xff] }
  0x3c   : > { %2408 = vmatprep.subr.bf16.mxu0 %v2756_v1 }
  0x3d   : > { %2443 = vmatpush3.bf16.msra.mxu1 %v2703_v21  ;;  %v1343_v21 = vrot.slane %v1341_v10, 1 }
  0x3e   : > { %2353 = vmatmul.mubr.bf16.gmra.mrb[12].mxu0 %v3029_v22  ;;  %2444 = vmatprep.subr.bf16.mxu1 %v2756_v1 }
  0x3f   : > { %2389 = vmatmul.mubr.bf16.gmra.mrb[12].mxu1 %v343_v24  ;;  %2356 = vmatprep.mubr.msk.bf16.mxu0 %vm2757_vm0, %v2756_v1  ;;  %v1366_v24 = vshrl.u32 %v2941_v53, 16  ;;  %v1344_v19 = vor.u32 %v1343_v21, %v1339_v9  ;;  %v567_v53 = vsel %vm539_vm1, %v562_v14, %v566_v15  ;;  %v908_v14 = vld [vmem:[%s2851_s18 + $0x18] sm:$0xff]  ;;  %v1128_v21 = vshrl.u32 %v3103_v0, 16 }
  0x40   : > { %2392 = vmatprep.mubr.msk.bf16.mxu1 %vm2757_vm0, %v2756_v1  ;;  %2409 = vmatpush3.bf16.msra.mxu0 %v2704_v25  ;;  %v3131_v25 = vld [vmem:[%s2851_s18 + $0x120] sm:$0xff] }
  0x41   : > { %2445 = vmatpush3.bf16.msra.mxu1 %v2705_v26  ;;  %2410 = vmatprep.subr.bf16.mxu0 %v2756_v1  ;;  %v1588_v26 = vshrl.u32 %v2955_v59, 16  ;;  %v3146_v59 = vpack.c.bf16 %v736_v18, %v735_v16  ;;  %v3154_v36 = vsel %vm539_vm1, %v1344_v19, %v2916_v42  ;;  %v1368_v38 = vor.u32 %v1366_v24, %v2973_v6  ;;  %v2717_v42 = vld [vmem:[%s3459_s1 + $0x160] sm:$0xff]   ;;  %v910_v19 = vld [vmem:[%s2851_s18 + $0x58] sm:$0xff] }
  0x42   : > { %2446 = vmatprep.subr.bf16.mxu1 %v2756_v1  ;;  %v1126_v18 = vrot.slane %v1124_v12, 1  ;;  %v2726_v24 = vld [vmem:[%s3459_s1 + $0x1c0] sm:$0xff]   ;;  %v2738_v12 = vld [vmem:[%s3459_s1 + $0x1b8] sm:$0xff]  }
  0x44   : > { %2411 = vmatpush3.bf16.msra.mxu0 %v2706_v27  ;;  %v1566_v27 = vor.u32 %v1565_v23, %v1561_v11  ;;  %v1132_v23 = vshll.u32 %v3146_v59, 16 }
  0x45   : > { %2447 = vmatpush3.bf16.msra.mxu1 %v2707_v28  ;;  %2468 = vmatprep.subr.bf16.mxu0 %v2756_v1  ;;  %v1316_v28 = vld [vmem:[%s2851_s18 + $0x140] sm:$0x1] }
  0x46   : > { %2357 = vmatmul.mubr.bf16.gmra.mrb[16].mxu0 %v185_v29  ;;  %2504 = vmatprep.subr.bf16.mxu1 %v2756_v1  ;;  %v1537_v29 = vld [vmem:[%s2851_s18 + $0x128] sm:$0xff]  ;;  %v3142_v32 = vpack.c.bf16 %v1316_v28, %v3131_v25  ;;  %v3158_v22 = vsel %vm539_vm1, %v1566_v27, %v2930_v47  ;;  %v911_v27 = vld [vmem:[%s2851_s18 + $0x78] sm:$0xff]  ;;  %v1134_v28 = vrot.slane %v1132_v23, 1  ;;  %v1754_v23 = vld [vmem:[%s2851_s18 + $0x80] sm:$0xff] }
  0x47   : > { %2393 = vmatmul.mubr.bf16.gmra.mrb[16].mxu1 %v344_v33  ;;  %2412 = vmatprep.mubr.msk.bf16.mxu0 %vm2757_vm0, %v2756_v1  ;;  %v3144_v33 = vpack.c.bf16 %v1538_v30, %v1537_v29  ;;  %v2728_v29 = vld [vmem:[%s3459_s1 + $0x1c8] sm:$0xff]   ;;  %v918_v30 = vpack.c.bf16 %v911_v27, %v910_v19 }
  0x48   : > { %2448 = vmatprep.mubr.msk.bf16.mxu1 %vm2757_vm0, %v2756_v1 }
  0x4e   : > { %2413 = vmatmul.mubr.bf16.vlgmr.msra.gmra.mrb[20].mxu0 %v551_v39  ;;  %v1370_v39 = vshll.u32 %v3142_v32, 16 }
  0x4f   : > { %2449 = vmatmul.mubr.bf16.vlgmr.msra.gmra.mrb[20].mxu1 %v740_v41  ;;  %2469 = vmatpush3.bf16.msra.mxu0 %v2708_v44  ;;  %v1590_v41 = vor.u32 %v1588_v26, %v2998_v13  ;;  %v1592_v44 = vshll.u32 %v3144_v33, 16  ;;  %v570_v13 = vor.u32 %v568_v31, %v566_v15  ;;  %v909_v15 = vld [vmem:[%s2851_s18 + $0x38] sm:$0xff]  ;;  %v2725_v26 = vld [vmem:[%s3459_s1 + $0x188] sm:$0xff]  }
  0x50   : > { %2470 = vmatprep.subr.bf16.mxu0 %v2756_v1  ;;  %2416 = vmatprep.mubr.msk.bf16.mxu0 %vm2757_vm0, %v2756_v1  ;;  %v3169_v47 = vrot.slane %v1370_v39, 1  ;;  %v1094_v39 = vld [vmem:[%s2851_s18 + $0x130] sm:$0x1] }
  0x51   : > { %2452 = vmatprep.mubr.msk.bf16.mxu1 %vm2757_vm0, %v2756_v1  ;;  %2505 = vmatpush3.bf16.msra.mxu1 %v2710_v48  ;;  %v3171_v6 = vrot.slane %v1592_v44, 1  ;;  %v2718_v48 = vld [vmem:[%s3459_s1 + $0x128] sm:$0xff]   ;;  %v575_v56 = vsel %vm539_vm1, %v570_v13, %v574_v45  ;;  %v913_v44 = vld [vmem:[%s2851_s18 + $0xb8] sm:$0xff] }
  0x52   : > { %2506 = vmatprep.subr.bf16.mxu1 %v2756_v1  ;;  %v3185_v51 = vsel %vm539_vm1, %v1368_v38, %v3169_v47  ;;  %v2730_v38 = vld [vmem:[%s3459_s1 + $0x1d0] sm:$0xff]  }
  0x53   : > { %2471 = vmatpush3.bf16.msra.mxu0 %v2709_v49  ;;  %v737_v49 = vld [vmem:[%s2851_s18 + $0xd0] sm:$0xff]  ;;  %v3189_v52 = vsel %vm539_vm1, %v1590_v41, %v3171_v6  ;;  %v912_v41 = vld [vmem:[%s2851_s18 + $0x98] sm:$0xff] }
  0x54   : > { %2472 = vmatprep.subr.bf16.mxu0 %v2756_v1 }
  0x55   : > { %2507 = vmatpush3.bf16.msra.mxu1 %v2712_v55  ;;  %v1085_v55 = vld [vmem:[%s2851_s18 + $0x10] sm:$0xfe] }
  0x56   : > { %2417 = vmatmul.mubr.bf16.gmra.mrb[24].mxu0 %v559_v63  ;;  %2508 = vmatprep.subr.bf16.mxu1 %v2756_v1  ;;  %v1095_v60 = vpack.c.bf16 %v3069_v37, %v1085_v55  ;;  %v576_v63 = vshrl.u32 %v3123_v20, 16  ;;  %v3216_v37 = vld [vmem:[%s2851_s18 + $0x110] sm:$0xff] }
  0x57   : > { %2453 = vmatmul.mubr.bf16.gmra.mrb[24].mxu1 %v3103_v0  ;;  %2473 = vmatpush3.bf16.msra.mxu0 %v2711_v57  ;;  %v3198_v57 = vpack.c.bf16 %v738_v50, %v737_v49  ;;  %v744_v9 = vpack.c.bf16 %v3216_v37, %v3216_v37  ;;  %v1130_v0 = vor.u32 %v1128_v21, %v1126_v18  ;;  %v2731_v50 = vld [vmem:[%s3459_s1 + $0x1a0] sm:$0xff]  }
  0x58   : > { %2420 = vmatprep.mubr.msk.bf16.mxu0 %vm2757_vm0, %v2756_v1  ;;  %2456 = vmatprep.mubr.msk.bf16.mxu1 %vm2757_vm0, %v2756_v1  ;;  %v1119_v4 = vshll.u32 %v1095_v60, 16  ;;  %v578_v7 = vor.u32 %v576_v63, %v574_v45  ;;  %v1117_v10 = vshrl.u32 %v1095_v60, 16  ;;  %v1099_v45 = vpack.c.bf16 %v1094_v39, %v3216_v37  ;;  %v914_v60 = vld [vmem:[%s2851_s18 + $0xd8] sm:$0xff]  ;;  %v2734_v63 = vld [vmem:[%s3459_s1 + $0x1a8] sm:$0xff]   ;;  %v1751_v21 = vld [vmem:[%s2851_s18 + $0x20] sm:$0xfc] }
  0x59   : > { %2474 = vmatprep.subr.bf16.mxu0 %v2756_v1  ;;  %2509 = vmatpush3.bf16.msra.mxu1 %v2714_v3  ;;  %v2722_v3 = vld [vmem:[%s3459_s1 + $0x138] sm:$0xff]   ;;  %v1135_v31 = vsel %vm539_vm1, %v1130_v0, %v1134_v28  ;;  %v1140_v35 = vshll.u32 %v3198_v57, 16  ;;  %v919_v49 = vpack.c.bf16 %v913_v44, %v912_v41  ;;  %v1144_v55 = vshrl.u32 %v3198_v57, 16 }
  0x5a   : > { %2510 = vmatprep.subr.bf16.mxu1 %v2756_v1  ;;  %v1121_v11 = vrot.slane %v1119_v4, 1 }
  0x5b   : > { %2475 = vmatpush3.bf16.msra.mxu0 %v2713_v40  ;;  %v917_v40 = vpack.c.bf16 %v909_v15, %v908_v14  ;;  %v1142_v13 = vrot.slane %v1140_v35, 1  ;;  %v2739_v14 = vld [vmem:[%s3459_s1 + $0x1f8] sm:$0xff]  }
  0x5c   : > { %2476 = vmatprep.subr.bf16.mxu0 %v2756_v1  ;;  %v1122_v16 = vor.u32 %v1121_v11, %v1117_v10  ;;  %v916_v10 = vld [vmem:[%s2851_s18 + $0x118] sm:$0xff]  ;;  %v1152_v11 = vshrl.u32 %v1099_v45, 16 }
  0x5d   : > { %2511 = vmatpush3.bf16.msra.mxu1 %v2716_v43  ;;  %v2724_v43 = vld [vmem:[%s3459_s1 + $0x180] sm:$0xff]   ;;  %v921_v15 = vpack.c.bf16 %v916_v10, %v916_v10 }
  0x5e   : > { %2421 = vmatmul.mubr.bf16.gmra.mrb[28].mxu0 %v567_v53  ;;  %2512 = vmatprep.subr.bf16.mxu1 %v2756_v1  ;;  %v1127_v20 = vsel %vm539_vm1, %v1122_v16, %v1126_v18  ;;  %v2727_v53 = vld [vmem:[%s3459_s1 + $0x190] sm:$0xff]   ;;  %v2740_v18 = vld [vmem:[%s3459_s1 + $0x200] sm:$0xff]  }
  0x5f   : > { %2457 = vmatmul.mubr.bf16.gmra.mrb[28].mxu1 %v3146_v59  ;;  %2477 = vmatpush3.bf16.msra.mxu0 %v2715_v34  ;;  %v1136_v34 = vshrl.u32 %v3146_v59, 16 }
  0x60   : > { %2424 = vmatprep.mubr.msk.bf16.mxu0 %vm2757_vm0, %v2756_v1  ;;  %2460 = vmatprep.mubr.msk.bf16.mxu1 %vm2757_vm0, %v2756_v1 }
  0x61   : > { %2478 = vmatprep.subr.bf16.mxu0 %v2756_v1  ;;  %2513 = vmatpush3.bf16.msra.mxu1 %v2717_v42  ;;  %v2729_v42 = vld [vmem:[%s3459_s1 + $0x198] sm:$0xff]   ;;  %v1138_v59 = vor.u32 %v1136_v34, %v1134_v28 }
  0x62   : > { %2514 = vmatprep.subr.bf16.mxu1 %v2756_v1 }
  0x63   : > { %2479 = vmatpush3.bf16.msra.mxu0 %v2718_v48  ;;  %v2732_v48 = vld [vmem:[%s3459_s1 + $0x1d8] sm:$0xff]  }
  0x64   : > { %2480 = vmatprep.subr.bf16.mxu0 %v2756_v1 }
  0x65   : > { %2515 = vmatpush3.bf16.msra.mxu1 %v2719_v54  ;;  %v1143_v54 = vsel %vm539_vm1, %v1138_v59, %v1142_v13 }
  0x66   : > { %2425 = vmatmul.mubr.bf16.gmra.mrb[32].mxu0 %v575_v56  ;;  %2516 = vmatprep.subr.bf16.mxu1 %v2756_v1  ;;  %v1148_v56 = vshll.u32 %v1099_v45, 16 }
  0x67   : > { %2461 = vmatmul.mubr.bf16.gmra.mrb[32].mxu1 %v3198_v57  ;;  %2428 = vmatprep.mubr.msk.bf16.mxu0 %vm2757_vm0, %v2756_v1  ;;  %v1146_v57 = vor.u32 %v1144_v55, %v1142_v13 }
  0x68   : > { %2464 = vmatprep.mubr.msk.bf16.mxu1 %vm2757_vm0, %v2756_v1  ;;  %2481 = vmatpush3.bf16.msra.mxu0 %v2720_v58  ;;  %v2733_v58 = vld [vmem:[%s3459_s1 + $0x1e0] sm:$0xff]   ;;  %v1150_v37 = vrot.slane %v1148_v56, 1 }
  0x69   : > { %2517 = vmatpush3.bf16.msra.mxu1 %v2721_v61  ;;  %2482 = vmatprep.subr.bf16.mxu0 %v2756_v1  ;;  %v915_v61 = vld [vmem:[%s2851_s18 + $0xf8] sm:$0xff] }
  0x6a   : > { %2518 = vmatprep.subr.bf16.mxu1 %v2756_v1  ;;  %v920_v4 = vpack.c.bf16 %v915_v61, %v914_v60  ;;  %v1154_v16 = vor.u32 %v1152_v11, %v1150_v37 }
  0x6c   : > { %2483 = vmatpush3.bf16.msra.mxu0 %v2722_v3  ;;  %v2735_v3 = vld [vmem:[%s3459_s1 + $0x1e8] sm:$0xff]  }
  0x6d   : > { %2519 = vmatpush3.bf16.msra.mxu1 %v2723_v5  ;;  %2540 = vmatprep.subr.bf16.mxu0 %v2756_v1  ;;  %v1151_v5 = vsel %vm539_vm1, %v1146_v57, %v1150_v37 }
  0x6e   : > { %2429 = vmatmul.mubr.bf16.gmra.mrb[36].mxu0 %v578_v7  ;;  %2576 = vmatprep.subr.bf16.mxu1 %v2756_v1  ;;  %v2736_v7 = vld [vmem:[%s3459_s1 + $0x1b0] sm:$0xff]  }
  0x6f   : > { %2465 = vmatmul.mubr.bf16.gmra.mrb[36].mxu1 %v744_v9  ;;  %2484 = vmatprep.mubr.msk.bf16.mxu0 %vm2757_vm0, %v2756_v1  ;;  %v2737_v9 = vld [vmem:[%s3459_s1 + $0x1f0] sm:$0xff]  }
  0x70   : > { %2520 = vmatprep.mubr.msk.bf16.mxu1 %vm2757_vm0, %v2756_v1 }
  0x76   : > { %2485 = vmatmul.mubr.bf16.vlgmr.msra.gmra.mrb[40].mxu0 %v917_v40  ;;  %v2741_v40 = vld [vmem:[%s3459_s1 + $0x208] sm:$0xff]  }
  0x77   : > { %2521 = vmatmul.mubr.bf16.vlgmr.msra.gmra.mrb[40].mxu1 %v1127_v20  ;;  %2541 = vmatpush3.bf16.msra.mxu0 %v2724_v43  ;;  %v1596_v43 = vshrl.u32 %v3144_v33, 16  ;;  %v2747_v20 = vld [vmem:[%s3459_s1 + $0x238] sm:$0xff]  }
  0x78   : > { %2542 = vmatprep.subr.bf16.mxu0 %v2756_v1  ;;  %2488 = vmatprep.mubr.msk.bf16.mxu0 %vm2757_vm0, %v2756_v1 }
  0x79   : > { %2524 = vmatprep.mubr.msk.bf16.mxu1 %vm2757_vm0, %v2756_v1  ;;  %2577 = vmatpush3.bf16.msra.mxu1 %v2726_v24  ;;  %v1760_v24 = vld [vmem:[%s2851_s18 + $0x140] sm:$0x3]  ;;  %v1598_v33 = vor.u32 %v1596_v43, %v3171_v6 }
  0x7a   : > { %2578 = vmatprep.subr.bf16.mxu1 %v2756_v1  ;;  %v1765_v28 = vpack.c.bf16 %v1760_v24, %v3131_v25 }
  0x7b   : > { %2543 = vmatpush3.bf16.msra.mxu0 %v2725_v26 }
  0x7c   : > { %2544 = vmatprep.subr.bf16.mxu0 %v2756_v1 }
  0x7d   : > { %2579 = vmatpush3.bf16.msra.mxu1 %v2728_v29 }
  0x7e   : > { %2489 = vmatmul.mubr.bf16.gmra.mrb[44].mxu0 %v918_v30  ;;  %2580 = vmatprep.subr.bf16.mxu1 %v2756_v1  ;;  %v1795_v30 = vrot.slane %v1765_v28, 1 }
  0x7f   : > { %2525 = vmatmul.mubr.bf16.gmra.mrb[44].mxu1 %v1135_v31  ;;  %2545 = vmatpush3.bf16.msra.mxu0 %v2727_v53  ;;  %v1755_v53 = vld [vmem:[%s2851_s18 + $0xa0] sm:$0xff] }
  0x80   : > { %2492 = vmatprep.mubr.msk.bf16.mxu0 %vm2757_vm0, %v2756_v1  ;;  %2528 = vmatprep.mubr.msk.bf16.mxu1 %vm2757_vm0, %v2756_v1  ;;  %v1756_v31 = vld [vmem:[%s2851_s18 + $0xc0] sm:$0xff] }
  0x81   : > { %2546 = vmatprep.subr.bf16.mxu0 %v2756_v1  ;;  %2581 = vmatpush3.bf16.msra.mxu1 %v2730_v38  ;;  %v1763_v34 = vpack.c.bf16 %v1756_v31, %v1755_v53 }
  0x82   : > { %2582 = vmatprep.subr.bf16.mxu1 %v2756_v1 }
  0x83   : > { %2547 = vmatpush3.bf16.msra.mxu0 %v2729_v42  ;;  %v1791_v35 = vrot.slane %v1763_v34, 1 }
  0x84   : > { %2548 = vmatprep.subr.bf16.mxu0 %v2756_v1 }
  0x85   : > { %2583 = vmatpush3.bf16.msra.mxu1 %v2732_v48 }
  0x86   : > { %2493 = vmatmul.mubr.bf16.gmra.mrb[48].mxu0 %v919_v49  ;;  %2584 = vmatprep.subr.bf16.mxu1 %v2756_v1 }
  0x87   : > { %2529 = vmatmul.mubr.bf16.gmra.mrb[48].mxu1 %v1143_v54  ;;  %2549 = vmatpush3.bf16.msra.mxu0 %v2731_v50 }
  0x88   : > { %2496 = vmatprep.mubr.msk.bf16.mxu0 %vm2757_vm0, %v2756_v1  ;;  %2532 = vmatprep.mubr.msk.bf16.mxu1 %vm2757_vm0, %v2756_v1 }
  0x89   : > { %2550 = vmatprep.subr.bf16.mxu0 %v2756_v1  ;;  %2585 = vmatpush3.bf16.msra.mxu1 %v2733_v58 }
  0x8a   : > { %2586 = vmatprep.subr.bf16.mxu1 %v2756_v1 }
  0x8b   : > { %2551 = vmatpush3.bf16.msra.mxu0 %v2734_v63 }
  0x8c   : > { %2552 = vmatprep.subr.bf16.mxu0 %v2756_v1 }
  0x8d   : > { %2587 = vmatpush3.bf16.msra.mxu1 %v2735_v3 }
  0x8e   : > { %2497 = vmatmul.mubr.bf16.gmra.mrb[52].mxu0 %v920_v4  ;;  %2588 = vmatprep.subr.bf16.mxu1 %v2756_v1 }
  0x8f   : > { %2533 = vmatmul.mubr.bf16.gmra.mrb[52].mxu1 %v1151_v5  ;;  %2500 = vmatprep.mubr.msk.bf16.mxu0 %vm2757_vm0, %v2756_v1 }
  0x90   : > { %2536 = vmatprep.mubr.msk.bf16.mxu1 %vm2757_vm0, %v2756_v1  ;;  %2553 = vmatpush3.bf16.msra.mxu0 %v2736_v7 }
  0x91   : > { %2589 = vmatpush3.bf16.msra.mxu1 %v2737_v9  ;;  %2554 = vmatprep.subr.bf16.mxu0 %v2756_v1 }
  0x92   : > { %2590 = vmatprep.subr.bf16.mxu1 %v2756_v1 }
  0x94   : > { %2555 = vmatpush3.bf16.msra.mxu0 %v2738_v12 }
  0x95   : > { %2591 = vmatpush3.bf16.msra.mxu1 %v2739_v14  ;;  %2612 = vmatprep.subr.bf16.mxu0 %v2756_v1 }
  0x96   : > { %2501 = vmatmul.mubr.bf16.gmra.mrb[56].mxu0 %v921_v15  ;;  %2648 = vmatprep.subr.bf16.mxu1 %v2756_v1 }
  0x97   : > { %2537 = vmatmul.mubr.bf16.gmra.mrb[56].mxu1 %v1154_v16  ;;  %2556 = vmatprep.mubr.msk.bf16.mxu0 %vm2757_vm0, %v2756_v1 }
  0x98   : > { %2592 = vmatprep.mubr.msk.bf16.mxu1 %vm2757_vm0, %v2756_v1 }
  0x9e   : > { %2557 = vmatmul.mubr.bf16.vlgmr.msra.gmra.mrb[60].mxu0 %v3154_v36  ;;  %v2742_v36 = vld [vmem:[%s3459_s1 + $0x210] sm:$0xff]  }
  0x9f   : > { %2593 = vmatmul.mubr.bf16.vlgmr.msra.gmra.mrb[60].mxu1 %v3158_v22  ;;  %2613 = vmatpush3.bf16.msra.mxu0 %v2740_v18  ;;  %v2743_v22 = vld [vmem:[%s3459_s1 + $0x218] sm:$0xff]  }
  0xa0   : > { %2614 = vmatprep.subr.bf16.mxu0 %v2756_v1  ;;  %2560 = vmatprep.mubr.msk.bf16.mxu0 %vm2757_vm0, %v2756_v1 }
  0xa1   : > { %2596 = vmatprep.mubr.msk.bf16.mxu1 %vm2757_vm0, %v2756_v1  ;;  %2656 = vmatpush3.bf16.msra.mxu1 %v2740_v18 }
  0xa2   : > { %2649 = vmatprep.subr.bf16.mxu1 %v2756_v1 }
  0xa3   : > { %2615 = vmatpush3.bf16.msra.mxu0 %v2741_v40 }
  0xa4   : > { %2616 = vmatprep.subr.bf16.mxu0 %v2756_v1 }
  0xa5   : > { %2657 = vmatpush3.bf16.msra.mxu1 %v2741_v40 }
  0xa6   : > { %2561 = vmatmul.mubr.bf16.gmra.mrb[64].mxu0 %v2963_v62  ;;  %2650 = vmatprep.subr.bf16.mxu1 %v2756_v1  ;;  %v2744_v62 = vld [vmem:[%s3459_s1 + $0x220] sm:$0xff]  }
  0xa7   : > { %2597 = vmatmul.mubr.bf16.gmra.mrb[64].mxu1 %v2968_v2  ;;  %2617 = vmatpush3.bf16.msra.mxu0 %v2742_v36  ;;  %v2745_v2 = vld [vmem:[%s3459_s1 + $0x228] sm:$0xff]  }
  0xa8   : > { %2564 = vmatprep.mubr.msk.bf16.mxu0 %vm2757_vm0, %v2756_v1  ;;  %2600 = vmatprep.mubr.msk.bf16.mxu1 %vm2757_vm0, %v2756_v1 }
  0xa9   : > { %2618 = vmatprep.subr.bf16.mxu0 %v2756_v1  ;;  %2658 = vmatpush3.bf16.msra.mxu1 %v2742_v36 }
  0xaa   : > { %2651 = vmatprep.subr.bf16.mxu1 %v2756_v1 }
  0xab   : > { %2619 = vmatpush3.bf16.msra.mxu0 %v2743_v22 }
  0xac   : > { %2620 = vmatprep.subr.bf16.mxu0 %v2756_v1 }
  0xad   : > { %2659 = vmatpush3.bf16.msra.mxu1 %v2743_v22 }
  0xae   : > { %2565 = vmatmul.mubr.bf16.gmra.mrb[68].mxu0 %v2982_v8  ;;  %2652 = vmatprep.subr.bf16.mxu1 %v2756_v1  ;;  %v2746_v8 = vld [vmem:[%s3459_s1 + $0x230] sm:$0xff]  }
  0xaf   : > { %2601 = vmatmul.mubr.bf16.gmra.mrb[68].mxu1 %v3008_v17  ;;  %2621 = vmatpush3.bf16.msra.mxu0 %v2744_v62  ;;  %v1374_v17 = vshrl.u32 %v3142_v32, 16  ;;  %v1753_v32 = vld [vmem:[%s2851_s18 + $0x60] sm:$0xff] }
  0xb0   : > { %2568 = vmatprep.mubr.msk.bf16.mxu0 %vm2757_vm0, %v2756_v1  ;;  %2604 = vmatprep.mubr.msk.bf16.mxu1 %vm2757_vm0, %v2756_v1  ;;  %v1762_v27 = vpack.c.bf16 %v1754_v23, %v1753_v32 }
  0xb1   : > { %2660 = vmatpush3.bf16.msra.mxu1 %v2744_v62  ;;  %2622 = vmatprep.subr.bf16.mxu0 %v2756_v1  ;;  %v1376_v26 = vor.u32 %v1374_v17, %v3169_v47 }
  0xb2   : > { %2653 = vmatprep.subr.bf16.mxu1 %v2756_v1  ;;  %v1789_v29 = vrot.slane %v1762_v27, 1 }
  0xb3   : > { %2623 = vmatpush3.bf16.msra.mxu0 %v2745_v2 }
  0xb4   : > { %2624 = vmatprep.subr.bf16.mxu0 %v2756_v1  ;;  %v1792_v38 = vsel %vm1787_vm2, %v1789_v29, %v1791_v35 }
  0xb5   : > { %2661 = vmatpush3.bf16.msra.mxu1 %v2745_v2 }
  0xb6   : > { %2569 = vmatmul.mubr.bf16.gmra.mrb[72].mxu0 %v3185_v51  ;;  %2654 = vmatprep.subr.bf16.mxu1 %v2756_v1  ;;  %v1752_v51 = vld [vmem:[%s2851_s18 + $0x40] sm:$0xff] }
  0xb7   : > { %2605 = vmatmul.mubr.bf16.gmra.mrb[72].mxu1 %v3189_v52  ;;  %2572 = vmatprep.mubr.msk.bf16.mxu0 %vm2757_vm0, %v2756_v1  ;;  %v1757_v52 = vld [vmem:[%s2851_s18 + $0xe0] sm:$0xff]  ;;  %v1761_v19 = vpack.c.bf16 %v1752_v51, %v1751_v21 }
  0xb8   : > { %2608 = vmatprep.mubr.msk.bf16.mxu1 %vm2757_vm0, %v2756_v1  ;;  %2625 = vmatpush3.bf16.msra.mxu0 %v2746_v8  ;;  %v1764_v0 = vpack.c.bf16 %v2928_v46, %v1757_v52 }
  0xb9   : > { %2662 = vmatpush3.bf16.msra.mxu1 %v2746_v8  ;;  %2626 = vmatprep.subr.bf16.mxu0 %v2756_v1  ;;  %v1788_v47 = vrot.slane %v1761_v19, 1 }
  0xba   : > { %2655 = vmatprep.subr.bf16.mxu1 %v2756_v1  ;;  %v1793_v6 = vrot.slane %v1764_v0, 1 }
  0xbb   : > { %v1790_v46 = vsel %vm1787_vm2, %v1788_v47, %v1789_v29 }
  0xbc   : > { %2627 = vmatpush3.bf16.msra.mxu0 %v2747_v20  ;;  %v1796_v25 = vsel %vm1787_vm2, %v1793_v6, %v1795_v30  ;;  %v1794_v39 = vsel %vm1787_vm2, %v1791_v35, %v1793_v6 }
  0xbd   : > { %2663 = vmatpush3.bf16.msra.mxu1 %v2747_v20 }
  0xbe   : > { %2573 = vmatmul.mubr.bf16.gmra.mrb[76].mxu0 %v1376_v26 }
  0xbf   : > { %2609 = vmatmul.mubr.bf16.gmra.mrb[76].mxu1 %v1598_v33  ;;  %2628 = vmatprep.mubr.msk.bf16.mxu0 %vm2757_vm0, %v2756_v1 }
  0xc0   : > { %2640 = vmatprep.mubr.msk.bf16.mxu1 %vm2757_vm0, %v2756_v1 }
  0xc6   : > { %2629 = vmatmul.mubr.bf16.vlgmr.msra.gmra.mrb[80].mxu0 %v1790_v46 }
  0xc7   : > { %2641 = vmatmul.mubr.bf16.vlgmr.msra.gmra.mrb[80].mxu1 %v1796_v25  ;;  %2632 = vmatprep.mubr.msk.bf16.mxu0 %vm2757_vm0, %v2756_v1 }
  0xc8   : > { %2644 = vmatprep.mubr.msk.bf16.mxu1 %vm2757_vm0, %v2756_v1 }
  0xce   : > { %2633 = vmatmul.mubr.bf16.gmra.mrb[84].mxu0 %v1792_v38 }
  0xcf   : > { %2645 = vmatmul.mubr.bf16.gmra.mrb[84].mxu1 %v1795_v30  ;;  %2636 = vmatprep.mubr.msk.bf16.mxu0 %vm2757_vm0, %v2756_v1 }
  0xd6   : > { %2637 = vmatmul.mubr.bf16.gmra.mrb[88].mxu0 %v1794_v39 }
  0xf9   : > { %v284_v41 = vpop.f32.mrb[0].mxu0 }
  0xfa   : > { %v443_v44 = vpop.f32.mrb[0].mxu1  ;;  %v2342_v42 = vpop.f32.mrb[1].mxu0 }
  0xfb   : > { %v490_v59 = vadd.f32 %v443_v44, %v284_v41  ;;  %v2378_v13 = vpop.f32.mrb[1].mxu1  ;;  %v287_v45 = vpop.f32.mrb[2].mxu0 }
  0xfc   : > { %v446_v48 = vpop.f32.mrb[2].mxu1  ;;  %v2343_v49 = vpop.f32.mrb[3].mxu0 }
  0xfd   : > { %v491_v50 = vadd.f32 %v446_v48, %v287_v45  ;;  %v2379_v54 = vpop.f32.mrb[3].mxu1 }
 0x101   : > { %v292_v55 = vpop.f32.mrb[4].mxu0 }
 0x102   : > { %v451_v56 = vpop.f32.mrb[4].mxu1  ;;  %v2346_v58 = vpop.f32.mrb[5].mxu0 }
 0x103   : > { %v492_v60 = vadd.f32 %v451_v56, %v292_v55  ;;  %v2382_v61 = vpop.f32.mrb[5].mxu1  ;;  %v295_v63 = vpop.f32.mrb[6].mxu0 }
 0x104   : > { %v454_v1 = vpop.f32.mrb[6].mxu1  ;;  %v2347_v57 = vpop.f32.mrb[7].mxu0 }
 0x105   : > { %v493_v37 = vadd.f32 %v454_v1, %v295_v63  ;;  %v2383_v3 = vpop.f32.mrb[7].mxu1 }
 0x109   : > { %v300_v4 = vpop.f32.mrb[8].mxu0 }
 0x10a   : > { %v459_v5 = vpop.f32.mrb[8].mxu1  ;;  %v2350_v7 = vpop.f32.mrb[9].mxu0 }
 0x10b   : > { %v494_v9 = vadd.f32 %v459_v5, %v300_v4  ;;  %v2386_v10 = vpop.f32.mrb[9].mxu1  ;;  %v303_v11 = vpop.f32.mrb[10].mxu0 }
 0x10c   : > { %v462_v12 = vpop.f32.mrb[10].mxu1  ;;  %v2351_v14 = vpop.f32.mrb[11].mxu0 }
 0x10d   : > { %v495_v15 = vadd.f32 %v462_v12, %v303_v11  ;;  %v2387_v16 = vpop.f32.mrb[11].mxu1 }
 0x111   : > { %v308_v18 = vpop.f32.mrb[12].mxu0 }
 0x112   : > { %v467_v40 = vpop.f32.mrb[12].mxu1  ;;  %v2354_v36 = vpop.f32.mrb[13].mxu0 }
 0x113   : > { %v496_v22 = vadd.f32 %v467_v40, %v308_v18  ;;  %v2390_v62 = vpop.f32.mrb[13].mxu1  ;;  %v311_v2 = vpop.f32.mrb[14].mxu0 }
 0x114   : > { %v470_v8 = vpop.f32.mrb[14].mxu1  ;;  %v2355_v17 = vpop.f32.mrb[15].mxu0 }
 0x115   : > { %v497_v43 = vadd.f32 %v470_v8, %v311_v2  ;;  %v2391_v20 = vpop.f32.mrb[15].mxu1 }
 0x119   : > { %v316_v21 = vpop.f32.mrb[16].mxu0 }
 0x11a   : > { %v2358_v51 = vpop.f32.mrb[17].mxu0  ;;  %v475_v32 = vpop.f32.mrb[16].mxu1 }
 0x11b   : > { %v498_v23 = vadd.f32 %v475_v32, %v316_v21  ;;  %v319_v52 = vpop.f32.mrb[18].mxu0  ;;  %v2394_v24 = vpop.f32.mrb[17].mxu1 }
 0x11c   : > { %v2359_v26 = vpop.f32.mrb[19].mxu0  ;;  %v478_v33 = vpop.f32.mrb[18].mxu1 }
 0x11d   : > { %v2395_v19 = vpop.f32.mrb[19].mxu1 }
 0x121   : > { %v666_v27 = vpop.f32.mrb[20].mxu0 }
 0x122   : > { %v713_v0 = vadd.f32 %v666_v27, %v490_v59  ;;  %v2414_v28 = vpop.f32.mrb[21].mxu0  ;;  %v843_v47 = vpop.f32.mrb[20].mxu1 }
 0x123   : > { %v669_v29 = vpop.f32.mrb[22].mxu0  ;;  %v2450_v6 = vpop.f32.mrb[21].mxu1 }
 0x124   : > { %v714_v30 = vadd.f32 %v669_v29, %v491_v50  ;;  %v890_v53 = vadd.f32 %v843_v47, %v713_v0  ;;  %v2415_v31 = vpop.f32.mrb[23].mxu0  ;;  %v846_v46 = vpop.f32.mrb[22].mxu1 }
 0x125   : > { %v2451_v34 = vpop.f32.mrb[23].mxu1 }
 0x126   : > { %v891_v25 = vadd.f32 %v846_v46, %v714_v30 }
 0x129   : > { %v674_v35 = vpop.f32.mrb[24].mxu0 }
 0x12a   : > { %v715_v38 = vadd.f32 %v674_v35, %v492_v60  ;;  %v2418_v39 = vpop.f32.mrb[25].mxu0  ;;  %v851_v41 = vpop.f32.mrb[24].mxu1 }
 0x12b   : > { %v677_v44 = vpop.f32.mrb[26].mxu0  ;;  %v2454_v42 = vpop.f32.mrb[25].mxu1 }
 0x12c   : > { %v716_v13 = vadd.f32 %v677_v44, %v493_v37  ;;  %v892_v45 = vadd.f32 %v851_v41, %v715_v38  ;;  %v2419_v48 = vpop.f32.mrb[27].mxu0  ;;  %v854_v59 = vpop.f32.mrb[26].mxu1 }
 0x12d   : > { %v2455_v49 = vpop.f32.mrb[27].mxu1 }
 0x12e   : > { %v893_v54 = vadd.f32 %v854_v59, %v716_v13 }
 0x131   : > { %v682_v55 = vpop.f32.mrb[28].mxu0 }
 0x132   : > { %v717_v56 = vadd.f32 %v682_v55, %v494_v9  ;;  %v2422_v50 = vpop.f32.mrb[29].mxu0  ;;  %v859_v58 = vpop.f32.mrb[28].mxu1 }
 0x133   : > { %v685_v61 = vpop.f32.mrb[30].mxu0  ;;  %v2458_v63 = vpop.f32.mrb[29].mxu1 }
 0x134   : > { %v718_v1 = vadd.f32 %v685_v61, %v495_v15  ;;  %v894_v57 = vadd.f32 %v859_v58, %v717_v56  ;;  %v2423_v3 = vpop.f32.mrb[31].mxu0  ;;  %v862_v60 = vpop.f32.mrb[30].mxu1 }
 0x135   : > { %v2459_v4 = vpop.f32.mrb[31].mxu1 }
 0x136   : > { %v895_v5 = vadd.f32 %v862_v60, %v718_v1 }
 0x139   : > { %v690_v7 = vpop.f32.mrb[32].mxu0 }
 0x13a   : > { %v719_v10 = vadd.f32 %v690_v7, %v496_v22  ;;  %v2426_v37 = vpop.f32.mrb[33].mxu0  ;;  %v867_v11 = vpop.f32.mrb[32].mxu1 }
 0x13b   : > { %v693_v12 = vpop.f32.mrb[34].mxu0  ;;  %v2462_v14 = vpop.f32.mrb[33].mxu1 }
 0x13c   : > { %v720_v16 = vadd.f32 %v693_v12, %v497_v43  ;;  %v896_v18 = vadd.f32 %v867_v11, %v719_v10  ;;  %v2427_v40 = vpop.f32.mrb[35].mxu0  ;;  %v870_v9 = vpop.f32.mrb[34].mxu1 }
 0x13d   : > { %v2463_v36 = vpop.f32.mrb[35].mxu1 }
 0x13e   : > { %v897_v62 = vadd.f32 %v870_v9, %v720_v16 }
 0x141   : > { %v698_v2 = vpop.f32.mrb[36].mxu0 }
 0x142   : > { %v721_v8 = vadd.f32 %v698_v2, %v498_v23  ;;  %v2430_v15 = vpop.f32.mrb[37].mxu0  ;;  %v875_v17 = vpop.f32.mrb[36].mxu1 }
 0x143   : > { %v701_v20 = vpop.f32.mrb[38].mxu0  ;;  %v2466_v21 = vpop.f32.mrb[37].mxu1 }
 0x144   : > { %v898_v51 = vadd.f32 %v875_v17, %v721_v8  ;;  %v2431_v32 = vpop.f32.mrb[39].mxu0  ;;  %v878_v52 = vpop.f32.mrb[38].mxu1 }
 0x145   : > { %v2467_v22 = vpop.f32.mrb[39].mxu1 }
 0x149   : > { %v1020_v24 = vpop.f32.mrb[40].mxu0 }
 0x14a   : > { %v1067_v26 = vadd.f32 %v1020_v24, %v890_v53  ;;  %v2486_v33 = vpop.f32.mrb[41].mxu0  ;;  %v1242_v19 = vpop.f32.mrb[40].mxu1 }
 0x14b   : > { %v1023_v43 = vpop.f32.mrb[42].mxu0  ;;  %v2522_v27 = vpop.f32.mrb[41].mxu1 }
 0x14c   : > { %v1068_v0 = vadd.f32 %v1023_v43, %v891_v25  ;;  %v1289_v28 = vadd.f32 %v1242_v19, %v1067_v26  ;;  %v2487_v47 = vpop.f32.mrb[43].mxu0  ;;  %v1245_v29 = vpop.f32.mrb[42].mxu1 }
 0x14d   : > { %v2523_v6 = vpop.f32.mrb[43].mxu1 }
 0x14e   : > { %v1290_v23 = vadd.f32 %v1245_v29, %v1068_v0 }
 0x151   : > { %v1028_v30 = vpop.f32.mrb[44].mxu0 }
 0x152   : > { %v1069_v31 = vadd.f32 %v1028_v30, %v892_v45  ;;  %v2490_v46 = vpop.f32.mrb[45].mxu0  ;;  %v1250_v34 = vpop.f32.mrb[44].mxu1 }
 0x153   : > { %v1031_v35 = vpop.f32.mrb[46].mxu0  ;;  %v2526_v38 = vpop.f32.mrb[45].mxu1 }
 0x154   : > { %v1070_v39 = vadd.f32 %v1031_v35, %v893_v54  ;;  %v1291_v41 = vadd.f32 %v1250_v34, %v1069_v31  ;;  %v2491_v44 = vpop.f32.mrb[47].mxu0  ;;  %v1253_v53 = vpop.f32.mrb[46].mxu1 }
 0x155   : > { %v2527_v42 = vpop.f32.mrb[47].mxu1 }
 0x156   : > { %v1292_v13 = vadd.f32 %v1253_v53, %v1070_v39 }
 0x159   : > { %v1036_v48 = vpop.f32.mrb[48].mxu0 }
 0x15a   : > { %v1071_v59 = vadd.f32 %v1036_v48, %v894_v57  ;;  %v2494_v25 = vpop.f32.mrb[49].mxu0  ;;  %v1258_v49 = vpop.f32.mrb[48].mxu1 }
 0x15b   : > { %v1039_v55 = vpop.f32.mrb[50].mxu0  ;;  %v2530_v56 = vpop.f32.mrb[49].mxu1 }
 0x15c   : > { %v1072_v50 = vadd.f32 %v1039_v55, %v895_v5  ;;  %v1293_v58 = vadd.f32 %v1258_v49, %v1071_v59  ;;  %v2495_v61 = vpop.f32.mrb[51].mxu0  ;;  %v1261_v45 = vpop.f32.mrb[50].mxu1 }
 0x15d   : > { %v2531_v63 = vpop.f32.mrb[51].mxu1 }
 0x15e   : > { %v1294_v1 = vadd.f32 %v1261_v45, %v1072_v50 }
 0x161   : > { %v1044_v3 = vpop.f32.mrb[52].mxu0 }
 0x162   : > { %v1073_v60 = vadd.f32 %v1044_v3, %v896_v18  ;;  %v2498_v54 = vpop.f32.mrb[53].mxu0  ;;  %v1266_v4 = vpop.f32.mrb[52].mxu1 }
 0x163   : > { %v1047_v7 = vpop.f32.mrb[54].mxu0  ;;  %v2534_v10 = vpop.f32.mrb[53].mxu1 }
 0x164   : > { %v1074_v37 = vadd.f32 %v1047_v7, %v897_v62  ;;  %v1295_v11 = vadd.f32 %v1266_v4, %v1073_v60  ;;  %v2499_v12 = vpop.f32.mrb[55].mxu0  ;;  %v1269_v57 = vpop.f32.mrb[54].mxu1 }
 0x165   : > { %v2535_v14 = vpop.f32.mrb[55].mxu1 }
 0x166   : > { %v1296_v16 = vadd.f32 %v1269_v57, %v1074_v37 }
 0x169   : > { %v1052_v40 = vpop.f32.mrb[56].mxu0 }
 0x16a   : > { %v1075_v9 = vadd.f32 %v1052_v40, %v898_v51  ;;  %v2502_v5 = vpop.f32.mrb[57].mxu0  ;;  %v1274_v36 = vpop.f32.mrb[56].mxu1 }
 0x16b   : > { %v1055_v2 = vpop.f32.mrb[58].mxu0  ;;  %v2538_v8 = vpop.f32.mrb[57].mxu1 }
 0x16c   : > { %v1297_v15 = vadd.f32 %v1274_v36, %v1075_v9  ;;  %v2503_v17 = vpop.f32.mrb[59].mxu0  ;;  %v1277_v20 = vpop.f32.mrb[58].mxu1 }
 0x16d   : > { %v2539_v18 = vpop.f32.mrb[59].mxu1 }
 0x171   : > { %v1464_v21 = vpop.f32.mrb[60].mxu0 }
 0x172   : > { %v1511_v32 = vadd.f32 %v1464_v21, %v1289_v28  ;;  %v2558_v52 = vpop.f32.mrb[61].mxu0  ;;  %v1686_v22 = vpop.f32.mrb[60].mxu1 }
 0x173   : > { %v1467_v62 = vpop.f32.mrb[62].mxu0  ;;  %v2594_v24 = vpop.f32.mrb[61].mxu1 }
 0x174   : > { %v1512_v26 = vadd.f32 %v1467_v62, %v1290_v23  ;;  %v1733_v33 = vadd.f32 %v1686_v22, %v1511_v32  ;;  %v2559_v19 = vpop.f32.mrb[63].mxu0  ;;  %v1689_v43 = vpop.f32.mrb[62].mxu1 }
 0x175   : > { %v2595_v27 = vpop.f32.mrb[63].mxu1 }
 0x176   : > { %v1734_v51 = vadd.f32 %v1689_v43, %v1512_v26 }
 0x179   : > { %v1472_v0 = vpop.f32.mrb[64].mxu0 }
 0x17a   : > { %v1513_v47 = vadd.f32 %v1472_v0, %v1291_v41  ;;  %v2562_v29 = vpop.f32.mrb[65].mxu0  ;;  %v1694_v6 = vpop.f32.mrb[64].mxu1 }
 0x17b   : > { %v1475_v30 = vpop.f32.mrb[66].mxu0  ;;  %v2598_v31 = vpop.f32.mrb[65].mxu1 }
 0x17c   : > { %v1514_v46 = vadd.f32 %v1475_v30, %v1292_v13  ;;  %v3429_v34 = vadd.f32 %v1694_v6, %v1513_v47  ;;  %v2563_v28 = vpop.f32.mrb[67].mxu0  ;;  %v1697_v35 = vpop.f32.mrb[66].mxu1 }
 0x17d   : > { %v2599_v38 = vpop.f32.mrb[67].mxu1 }
 0x17e   : > { %v3431_v39 = vadd.f32 %v1697_v35, %v1514_v46 }
 0x181   : > { %v1480_v23 = vpop.f32.mrb[68].mxu0 }
 0x182   : > { %v1515_v44 = vadd.f32 %v1480_v23, %v1293_v58  ;;  %v2566_v53 = vpop.f32.mrb[69].mxu0  ;;  %v1702_v42 = vpop.f32.mrb[68].mxu1 }
 0x183   : > { %v1483_v48 = vpop.f32.mrb[70].mxu0  ;;  %v2602_v59 = vpop.f32.mrb[69].mxu1 }
 0x184   : > { %v1516_v25 = vadd.f32 %v1483_v48, %v1294_v1  ;;  %v3433_v41 = vadd.f32 %v1702_v42, %v1515_v44  ;;  %v2567_v49 = vpop.f32.mrb[71].mxu0  ;;  %v1705_v55 = vpop.f32.mrb[70].mxu1 }
 0x185   : > { %v2603_v56 = vpop.f32.mrb[71].mxu1 }
 0x186   : > { %v3435_v13 = vadd.f32 %v1705_v55, %v1516_v25 }
 0x189   : > { %v1488_v50 = vpop.f32.mrb[72].mxu0 }
 0x18a   : > { %v1517_v61 = vadd.f32 %v1488_v50, %v1295_v11  ;;  %v2570_v45 = vpop.f32.mrb[73].mxu0  ;;  %v1710_v63 = vpop.f32.mrb[72].mxu1 }
 0x18b   : > { %v1491_v3 = vpop.f32.mrb[74].mxu0  ;;  %v2606_v60 = vpop.f32.mrb[73].mxu1 }
 0x18c   : > { %v1518_v54 = vadd.f32 %v1491_v3, %v1296_v16  ;;  %v1739_v58 = vadd.f32 %v1710_v63, %v1517_v61  ;;  %v2571_v4 = vpop.f32.mrb[75].mxu0  ;;  %v1713_v7 = vpop.f32.mrb[74].mxu1  ;;  %v2163_v16 = vld [vmem:[%s3460_s2] ss:$0 sm:$0xff] }
 0x18d   : > { %v2607_v10 = vpop.f32.mrb[75].mxu1 }
 0x18e   : > { %v1740_v37 = vadd.f32 %v1713_v7, %v1518_v54 }
 0x191   : > { %v1496_v1 = vpop.f32.mrb[76].mxu0 }
 0x192   : > { %v1519_v12 = vadd.f32 %v1496_v1, %v1297_v15  ;;  %v2574_v57 = vpop.f32.mrb[77].mxu0  ;;  %v1718_v14 = vpop.f32.mrb[76].mxu1 }
 0x193   : > { %v1499_v40 = vpop.f32.mrb[78].mxu0  ;;  %v2610_v9 = vpop.f32.mrb[77].mxu1 }
 0x194   : > { %v1741_v5 = vadd.f32 %v1718_v14, %v1519_v12  ;;  %v2575_v36 = vpop.f32.mrb[79].mxu0  ;;  %v1721_v11 = vpop.f32.mrb[78].mxu1 }
 0x195   : > { %v2611_v2 = vpop.f32.mrb[79].mxu1 }
 0x199   : > { %v1884_v8 = vpop.f32.mrb[80].mxu0 }
 0x19a   : > { %v1931_v17 = vadd.f32 %v1884_v8, %v1733_v33  ;;  %v1908_v20 = vpop.f32.mrb[80].mxu1  ;;  %v2630_v18 = vpop.f32.mrb[81].mxu0 }
 0x19b   : > { %v1937_v21 = vadd.f32 %v1908_v20, %v1739_v58  ;;  %v2642_v32 = vpop.f32.mrb[81].mxu1  ;;  %v1887_v15 = vpop.f32.mrb[82].mxu0 }
 0x19c   : > { %v1965_v52 = vadd.f32 %v2163_v16, %v1931_v17  ;;  %v1932_v22 = vadd.f32 %v1887_v15, %v1734_v51  ;;  %v1911_v62 = vpop.f32.mrb[82].mxu1  ;;  %v2631_v24 = vpop.f32.mrb[83].mxu0 }
 0x19d   : > { %v1971_v26 = vadd.f32 %v2163_v16, %v1937_v21  ;;  %v1938_v19 = vadd.f32 %v1911_v62, %v1740_v37  ;;  %v2643_v43 = vpop.f32.mrb[83].mxu1 }
 0x19e   : > { %v1966_v27 = vadd.f32 %v2163_v16, %v1932_v22  ;;  %v1974_v47 = vmax.f32 %v1965_v52, 0.0 }
 0x19f   : > { %v1972_v0 = vadd.f32 %v2163_v16, %v1938_v19  ;;  %v1980_v6 = vmax.f32 %v1971_v26, 0.0 }
 0x1a0   : > { %v1975_v29 = vmax.f32 %v1966_v27, 0.0 }
 0x1a1   : > { %v1981_v33 = vmax.f32 %v1972_v0, 0.0  ;;  %v1892_v51 = vpop.f32.mrb[84].mxu0 }
 0x1a2   : > { %v2187_v30 = vpack.c.bf16 %v1975_v29, %v1974_v47  ;;  %v1933_v31 = vadd.f32 %v1892_v51, %v3429_v34  ;;  %v1916_v46 = vpop.f32.mrb[84].mxu1  ;;  %v2634_v28 = vpop.f32.mrb[85].mxu0 }
 0x1a3   : > { %v2202_v35 = vpack.c.bf16 %v1981_v33, %v1980_v6  ;;  %v1939_v38 = vadd.f32 %v1916_v46, %v1741_v5  ;;  %v1895_v23 = vpop.f32.mrb[86].mxu0  ;;  %v2646_v44 = vpop.f32.mrb[85].mxu1 }
 0x1a4   : > { %2188 = vst [vmem:[%s3444_s21] sm:$0xff] %v2187_v30   ;;  %v1967_v53 = vadd.f32 %v2163_v16, %v1933_v31  ;;  %v1934_v42 = vadd.f32 %v1895_v23, %v3431_v39  ;;  %v2635_v48 = vpop.f32.mrb[87].mxu0  ;;  %v1919_v59 = vpop.f32.mrb[86].mxu1 }
 0x1a5   : > { %2206 = vst [vmem:[%s3444_s21 + $0x18] sm:$0xff] %v2202_v35   ;;  %v1973_v25 = vadd.f32 %v2163_v16, %v1939_v38  ;;  %v2647_v49 = vpop.f32.mrb[87].mxu1 }
 0x1a6   : > { %v1968_v55 = vadd.f32 %v2163_v16, %v1934_v42  ;;  %v1976_v34 = vmax.f32 %v1967_v53, 0.0 }
 0x1a7   : > { %v1982_v56 = vmax.f32 %v1973_v25, 0.0 }
 0x1a8   : > { %v1977_v50 = vmax.f32 %v1968_v55, 0.0 }
 0x1a9   : > { %v2183_v61 = vpack.c.bf16 %v1982_v56, %v1982_v56  ;;  %v1900_v45 = vpop.f32.mrb[88].mxu0 }
 0x1aa   : > { %v2192_v63 = vpack.c.bf16 %v1977_v50, %v1976_v34  ;;  %v1935_v3 = vadd.f32 %v1900_v45, %v3433_v41  ;;  %v2638_v60 = vpop.f32.mrb[89].mxu0 }
 0x1ab   : > { %2028 = vst [vmem:[%s3444_s21 + $0x20] sm:$0xf] %v2183_v61  ;;  %v1903_v54 = vpop.f32.mrb[90].mxu0 }
 0x1ac   : > { %2204 = vst [vmem:[%s3444_s21 + $0x8] sm:$0xff] %v2192_v63   ;;  %v1969_v39 = vadd.f32 %v2163_v16, %v1935_v3  ;;  %v1936_v58 = vadd.f32 %v1903_v54, %v3435_v13  ;;  %v2639_v4 = vpop.f32.mrb[91].mxu0 }
 0x1ae   : > { %v1970_v7 = vadd.f32 %v2163_v16, %v1936_v58  ;;  %v1978_v10 = vmax.f32 %v1969_v39, 0.0 }
 0x1b0   : > { %v1979_v37 = vmax.f32 %v1970_v7, 0.0 }
 0x1b2   : > { %v2197_v1 = vpack.c.bf16 %v1979_v37, %v1978_v10 }
 0x1b4   : > { %2205 = vst [vmem:[%s3444_s21 + $0x10] sm:$0xff] %v2197_v1  }
 0x1b5 PF: > { %s13_s12 = sadd.s32 1, %s2754_s12  }
 0x1b6   : > { %p10_p4 = scmp.ge.s32.totalorder %s13_s12, 4  }
 0x1b8   :  { %12 = sbr.rel (!%p10_p4) target bundleno = 1 (0x1), region = 62 }

// kernel: bottleneck_forward.5
= control target key start
LH: loop header
LB: loop body
LE: loop exit
PB: predicated region body
PF: predicated region fallthrough
CT: control target
= control target key end

     0   :  { %s909_s0 = inlined_call_operand.vmem [shape: bf16[128,128], index: 0, kind: input, shape index: {}]   ;;  %s910_s1 = inlined_call_operand.vmem [shape: bf16[128,128], index: 1, kind: input, shape index: {}]   ;;  %s911_s2 = inlined_call_operand.vmem [shape: bf16[128,128], index: 2, kind: input, shape index: {}]   ;;  %s912_s3 = inlined_call_operand.vmem [shape: bf16[128,128], index: 3, kind: input, shape index: {}]   ;;  %s913_s4 = inlined_call_operand.vmem [shape: f32[1,128], index: 4, kind: input, shape index: {}]   ;;  %s914_s5 = inlined_call_operand.hbm [shape: f32[128,128], index: 5, kind: output, shape index: {}]  }
   0x1   :  { %v691_v0 = vld [vmem:[%s912_s3] sm:$0xff]   ;;  %v693_v2 = vld [vmem:[%s912_s3 + $0x8] sm:$0xff]   ;;  %v695_v4 = vld [vmem:[%s912_s3 + $0x10] sm:$0xff]  }
   0x2   :  { %v692_v1 = vld [vmem:[%s910_s1] sm:$0xff]   ;;  %608 = vmatprep.subr.bf16.mxu1 %v691_v0  ;;  %v694_v3 = vld [vmem:[%s910_s1 + $0x8] sm:$0xff]   ;;  %v696_v5 = vld [vmem:[%s910_s1 + $0x10] sm:$0xff]  }
   0x3   :  { %640 = vmatprep.subr.bf16.mxu0 %v692_v1  ;;  %609 = vmatpush3.bf16.msra.mxu1 %v691_v0  ;;  %v697_v6 = vld [vmem:[%s912_s3 + $0x18] sm:$0xff]   ;;  %v699_v8 = vld [vmem:[%s912_s3 + $0x20] sm:$0xff]   ;;  %v701_v10 = vld [vmem:[%s912_s3 + $0x28] sm:$0xff]  }
   0x4   :  { %641 = vmatpush3.bf16.msra.mxu0 %v692_v1  ;;  %610 = vmatprep.subr.bf16.mxu1 %v693_v2  ;;  %v698_v7 = vld [vmem:[%s910_s1 + $0x18] sm:$0xff]   ;;  %v700_v9 = vld [vmem:[%s910_s1 + $0x20] sm:$0xff]   ;;  %v702_v11 = vld [vmem:[%s910_s1 + $0x28] sm:$0xff]  }
   0x5   :  { %642 = vmatprep.subr.bf16.mxu0 %v694_v3  ;;  %v707_v12 = vld [vmem:[%s911_s2] sm:$0xff]   ;;  %v703_v14 = vld [vmem:[%s912_s3 + $0x30] sm:$0xff]   ;;  %v705_v16 = vld [vmem:[%s912_s3 + $0x38] sm:$0xff]  }
   0x6   :  { %v708_v13 = vld [vmem:[%s909_s0] sm:$0xff]   ;;  %624 = vmatprep.mubr.bf16.mxu1 %v707_v12  ;;  %v704_v15 = vld [vmem:[%s910_s1 + $0x30] sm:$0xff]   ;;  %v706_v17 = vld [vmem:[%s910_s1 + $0x38] sm:$0xff]  }
   0x7   :  { %611 = vmatpush3.bf16.msra.mxu1 %v693_v2  ;;  %656 = vmatprep.mubr.bf16.mxu0 %v708_v13  ;;  %v709_v18 = vld [vmem:[%s911_s2 + $0x8] sm:$0xff]   ;;  %v711_v20 = vld [vmem:[%s911_s2 + $0x10] sm:$0xff]  }
   0x8   :  { %643 = vmatpush3.bf16.msra.mxu0 %v694_v3  ;;  %612 = vmatprep.subr.bf16.mxu1 %v695_v4  ;;  %v710_v19 = vld [vmem:[%s909_s0 + $0x8] sm:$0xff]   ;;  %v712_v21 = vld [vmem:[%s909_s0 + $0x10] sm:$0xff]  }
   0x9   :  { %644 = vmatprep.subr.bf16.mxu0 %v696_v5 }
   0xb   :  { %613 = vmatpush3.bf16.msra.mxu1 %v695_v4 }
   0xc   :  { %645 = vmatpush3.bf16.msra.mxu0 %v696_v5  ;;  %614 = vmatprep.subr.bf16.mxu1 %v697_v6 }
   0xd   :  { %646 = vmatprep.subr.bf16.mxu0 %v698_v7 }
   0xf   :  { %615 = vmatpush3.bf16.msra.mxu1 %v697_v6 }
  0x10   :  { %647 = vmatpush3.bf16.msra.mxu0 %v698_v7  ;;  %616 = vmatprep.subr.bf16.mxu1 %v699_v8 }
  0x11   :  { %648 = vmatprep.subr.bf16.mxu0 %v700_v9 }
  0x13   :  { %617 = vmatpush3.bf16.msra.mxu1 %v699_v8 }
  0x14   :  { %649 = vmatpush3.bf16.msra.mxu0 %v700_v9  ;;  %618 = vmatprep.subr.bf16.mxu1 %v701_v10 }
  0x15   :  { %650 = vmatprep.subr.bf16.mxu0 %v702_v11 }
  0x17   :  { %619 = vmatpush3.bf16.msra.mxu1 %v701_v10 }
  0x18   :  { %651 = vmatpush3.bf16.msra.mxu0 %v702_v11  ;;  %620 = vmatprep.subr.bf16.mxu1 %v703_v14 }
  0x19   :  { %652 = vmatprep.subr.bf16.mxu0 %v704_v15 }
  0x1b   :  { %621 = vmatpush3.bf16.msra.mxu1 %v703_v14 }
  0x1c   :  { %653 = vmatpush3.bf16.msra.mxu0 %v704_v15  ;;  %622 = vmatprep.subr.bf16.mxu1 %v705_v16 }
  0x1d   :  { %654 = vmatprep.subr.bf16.mxu0 %v706_v17 }
  0x1f   :  { %623 = vmatpush3.bf16.msra.mxu1 %v705_v16 }
  0x20   :  { %655 = vmatpush3.bf16.msra.mxu0 %v706_v17 }
  0x21   :  { %10 = vsyncpa [#allocation3], 0  ;;  %v713_v22 = vld [vmem:[%s911_s2 + $0x18] sm:$0xff]   ;;  %v715_v24 = vld [vmem:[%s911_s2 + $0x20] sm:$0xff]  }
  0x22   :  { %625 = vmatmul.mubr.bf16.vlgmr.msra.gmra.mrb[0].mxu1 %v709_v18  ;;  %v714_v23 = vld [vmem:[%s909_s0 + $0x18] sm:$0xff]   ;;  %v716_v25 = vld [vmem:[%s909_s0 + $0x20] sm:$0xff]   ;;  %v717_v26 = vld [vmem:[%s911_s2 + $0x28] sm:$0xff]  }
  0x23   :  { %657 = vmatmul.mubr.bf16.vlgmr.msra.gmra.mrb[0].mxu0 %v710_v19  ;;  %628 = vmatprep.mubr.bf16.mxu1 %v711_v20  ;;  %v718_v27 = vld [vmem:[%s909_s0 + $0x28] sm:$0xff]   ;;  %v719_v28 = vld [vmem:[%s911_s2 + $0x30] sm:$0xff]   ;;  %v721_v30 = vld [vmem:[%s911_s2 + $0x38] sm:$0xff]  }
  0x24   :  { %660 = vmatprep.mubr.bf16.mxu0 %v712_v21  ;;  %v720_v29 = vld [vmem:[%s909_s0 + $0x30] sm:$0xff]   ;;  %v722_v31 = vld [vmem:[%s909_s0 + $0x38] sm:$0xff]   ;;  %v879_v34 = vld [vmem:[%s913_s4] ss:$0 sm:$0xff]  ;;  %s747_s0 = smov [#allocation2]  }
  0x25   :  { %s532_s2 = sshll.u32 %s747_s0, 4  ;;  %s533_s2 = int_to_ptr.vmem [resolvable:$true] %s532_s2 }
  0x26   :  { %s723_s4 = scalar_lea.vmem %s533_s2, 2048  ;;  %p728_p1 = scmp.lt.s32.totalorder %s533_s2, %s533_s2 }
  0x27   :  { %p724_p0 = scmp.ne.s32.totalorder %s533_s2, %s723_s4  ;;  %p729_p2 = scmp.lt.s32.totalorder %s723_s4, %s723_s4 }
  0x29   :  { %p730_p3 = por %p729_p2, %p728_p1 }
  0x2a   :  { %629 = vmatmul.mubr.bf16.gmra.mrb[4].mxu1 %v713_v22 }
  0x2b   :  { %661 = vmatmul.mubr.bf16.gmra.mrb[4].mxu0 %v714_v23  ;;  %632 = vmatprep.mubr.bf16.mxu1 %v715_v24  ;;  %p731_p4 = pnand %p730_p3, %p724_p0 }
  0x2c   :  { %664 = vmatprep.mubr.bf16.mxu0 %v716_v25 }
  0x32   :  { %633 = vmatmul.mubr.bf16.gmra.mrb[8].mxu1 %v717_v26 }
  0x33   :  { %665 = vmatmul.mubr.bf16.gmra.mrb[8].mxu0 %v718_v27  ;;  %636 = vmatprep.mubr.bf16.mxu1 %v719_v28 }
  0x34   :  { %668 = vmatprep.mubr.bf16.mxu0 %v720_v29 }
  0x3a   :  { %637 = vmatmul.mubr.bf16.gmra.mrb[12].mxu1 %v721_v30 }
  0x3b   :  { %669 = vmatmul.mubr.bf16.gmra.mrb[12].mxu0 %v722_v31 }
  0xf5   :  { %v626_v32 = vpop.f32.mrb[0].mxu1 }
  0xf6   :  { %v658_v33 = vpop.f32.mrb[0].mxu0  ;;  %v216_v35 = vpop.f32.mrb[1].mxu1 }
  0xf7   :  { %v418_v36 = vadd.f32 %v658_v33, %v626_v32  ;;  %v409_v37 = vpop.f32.mrb[1].mxu0  ;;  %v627_v38 = vpop.f32.mrb[2].mxu1 }
  0xf8   :  { %v410_v39 = vadd.f32 %v409_v37, %v216_v35  ;;  %v659_v40 = vpop.f32.mrb[2].mxu0  ;;  %v219_v41 = vpop.f32.mrb[3].mxu1 }
  0xf9   :  { %v481_v42 = vadd.f32 %v879_v34, %v418_v36  ;;  %v421_v43 = vadd.f32 %v659_v40, %v627_v38  ;;  %v412_v44 = vpop.f32.mrb[3].mxu0 }
  0xfa   :  { %v479_v45 = vadd.f32 %v879_v34, %v410_v39  ;;  %v413_v46 = vadd.f32 %v412_v44, %v219_v41 }
  0xfb   :  { %v497_v47 = vmax.f32 %v481_v42, 0.0  ;;  %v482_v48 = vadd.f32 %v879_v34, %v421_v43 }
  0xfc   :  { %v495_v49 = vmax.f32 %v479_v45, 0.0  ;;  %v480_v50 = vadd.f32 %v879_v34, %v413_v46 }
  0xfd   :  { %513 = vst [vmem:[#allocation2 + $0x10] sm:$0xff] %v497_v47  ;;  %v498_v51 = vmax.f32 %v482_v48, 0.0  ;;  %v630_v52 = vpop.f32.mrb[4].mxu1 }
  0xfe   :  { %511 = vst [vmem:[#allocation2] sm:$0xff] %v495_v49  ;;  %v496_v53 = vmax.f32 %v480_v50, 0.0  ;;  %v662_v54 = vpop.f32.mrb[4].mxu0  ;;  %v232_v55 = vpop.f32.mrb[5].mxu1 }
  0xff   :  { %514 = vst [vmem:[#allocation2 + $0x18] sm:$0xff] %v498_v51  ;;  %v434_v56 = vadd.f32 %v662_v54, %v630_v52  ;;  %v425_v57 = vpop.f32.mrb[5].mxu0  ;;  %v631_v58 = vpop.f32.mrb[6].mxu1 }
 0x100   :  { %512 = vst [vmem:[#allocation2 + $0x8] sm:$0xff] %v496_v53  ;;  %v426_v59 = vadd.f32 %v425_v57, %v232_v55  ;;  %v663_v60 = vpop.f32.mrb[6].mxu0  ;;  %v235_v61 = vpop.f32.mrb[7].mxu1 }
 0x101   :  { %v485_v62 = vadd.f32 %v879_v34, %v434_v56  ;;  %v437_v63 = vadd.f32 %v663_v60, %v631_v58  ;;  %v428_v0 = vpop.f32.mrb[7].mxu0 }
 0x102   :  { %v483_v1 = vadd.f32 %v879_v34, %v426_v59  ;;  %v429_v2 = vadd.f32 %v428_v0, %v235_v61 }
 0x103   :  { %v501_v3 = vmax.f32 %v485_v62, 0.0  ;;  %v486_v4 = vadd.f32 %v879_v34, %v437_v63 }
 0x104   :  { %v499_v5 = vmax.f32 %v483_v1, 0.0  ;;  %v484_v6 = vadd.f32 %v879_v34, %v429_v2 }
 0x105   :  { %517 = vst [vmem:[#allocation2 + $0x30] sm:$0xff] %v501_v3  ;;  %v502_v7 = vmax.f32 %v486_v4, 0.0  ;;  %v634_v8 = vpop.f32.mrb[8].mxu1 }
 0x106   :  { %515 = vst [vmem:[#allocation2 + $0x20] sm:$0xff] %v499_v5  ;;  %v500_v9 = vmax.f32 %v484_v6, 0.0  ;;  %v666_v10 = vpop.f32.mrb[8].mxu0  ;;  %v248_v11 = vpop.f32.mrb[9].mxu1 }
 0x107   :  { %518 = vst [vmem:[#allocation2 + $0x38] sm:$0xff] %v502_v7  ;;  %v450_v12 = vadd.f32 %v666_v10, %v634_v8  ;;  %v441_v13 = vpop.f32.mrb[9].mxu0  ;;  %v635_v14 = vpop.f32.mrb[10].mxu1 }
 0x108   :  { %516 = vst [vmem:[#allocation2 + $0x28] sm:$0xff] %v500_v9  ;;  %v442_v15 = vadd.f32 %v441_v13, %v248_v11  ;;  %v667_v16 = vpop.f32.mrb[10].mxu0  ;;  %v251_v17 = vpop.f32.mrb[11].mxu1 }
 0x109   :  { %v489_v18 = vadd.f32 %v879_v34, %v450_v12  ;;  %v453_v19 = vadd.f32 %v667_v16, %v635_v14  ;;  %v444_v20 = vpop.f32.mrb[11].mxu0 }
 0x10a   :  { %v487_v21 = vadd.f32 %v879_v34, %v442_v15  ;;  %v445_v22 = vadd.f32 %v444_v20, %v251_v17 }
 0x10b   :  { %v505_v23 = vmax.f32 %v489_v18, 0.0  ;;  %v490_v24 = vadd.f32 %v879_v34, %v453_v19 }
 0x10c   :  { %v503_v25 = vmax.f32 %v487_v21, 0.0  ;;  %v488_v26 = vadd.f32 %v879_v34, %v445_v22 }
 0x10d   :  { %521 = vst [vmem:[#allocation2 + $0x50] sm:$0xff] %v505_v23  ;;  %v506_v27 = vmax.f32 %v490_v24, 0.0  ;;  %v638_v28 = vpop.f32.mrb[12].mxu1 }
 0x10e   :  { %519 = vst [vmem:[#allocation2 + $0x40] sm:$0xff] %v503_v25  ;;  %v504_v29 = vmax.f32 %v488_v26, 0.0  ;;  %v670_v30 = vpop.f32.mrb[12].mxu0  ;;  %v264_v31 = vpop.f32.mrb[13].mxu1 }
 0x10f   :  { %522 = vst [vmem:[#allocation2 + $0x58] sm:$0xff] %v506_v27  ;;  %v466_v32 = vadd.f32 %v670_v30, %v638_v28  ;;  %v457_v33 = vpop.f32.mrb[13].mxu0  ;;  %v639_v35 = vpop.f32.mrb[14].mxu1 }
 0x110   :  { %520 = vst [vmem:[#allocation2 + $0x48] sm:$0xff] %v504_v29  ;;  %v458_v36 = vadd.f32 %v457_v33, %v264_v31  ;;  %v671_v37 = vpop.f32.mrb[14].mxu0  ;;  %v267_v38 = vpop.f32.mrb[15].mxu1 }
 0x111   :  { %v493_v39 = vadd.f32 %v879_v34, %v466_v32  ;;  %v469_v40 = vadd.f32 %v671_v37, %v639_v35  ;;  %v460_v41 = vpop.f32.mrb[15].mxu0 }
 0x112   :  { %v491_v42 = vadd.f32 %v879_v34, %v458_v36  ;;  %v461_v43 = vadd.f32 %v460_v41, %v267_v38 }
 0x113   :  { %v509_v44 = vmax.f32 %v493_v39, 0.0  ;;  %v494_v45 = vadd.f32 %v879_v34, %v469_v40 }
 0x114   :  { %v507_v46 = vmax.f32 %v491_v42, 0.0  ;;  %v492_v47 = vadd.f32 %v879_v34, %v461_v43 }
 0x115   :  { %525 = vst [vmem:[#allocation2 + $0x70] sm:$0xff] %v509_v44  ;;  %v510_v48 = vmax.f32 %v494_v45, 0.0 }
 0x116   :  { %523 = vst [vmem:[#allocation2 + $0x60] sm:$0xff] %v507_v46  ;;  %v508_v49 = vmax.f32 %v492_v47, 0.0 }
 0x117   :  { %526 = vst [vmem:[#allocation2 + $0x78] sm:$0xff] %v510_v48 }
 0x118   :  { %524 = vst [vmem:[#allocation2 + $0x68] sm:$0xff] %v508_v49 }
 0x119   :  { %734 = shalt.err (!%p731_p4)
}
 0x11a   :  { %s735_s3 = scalar_lea.hbm %s914_s5, 2048 }
 0x11b   :  { %p736_p5 = scmp.ne.s32.totalorder %s914_s5, %s735_s3  ;;  %p739_p6 = scmp.lt.u32.totalorder %s735_s3, %s914_s5 }
 0x11d   :  { %p741_p7 = pnand %p739_p6, %p736_p5 }
 0x11f   :  { %744 = shalt.err (!%p741_p7)
}
 0x120   :  { %s748_s12 = smov 128   ;;  %s749_s13 = smov 8  }
 0x121   :  { %538 = dma.vmem_to_hbm [thread:$0]  %s533_s2, 2048, %s914_s5, [#allocation3], %s748_s12, %s748_s12, %s749_s13  }
 0x122   :  { %745 = dma.done.wait [#allocation3], 2048  }
 0x123   :  { %746 = vsyncadd [#allocation3], 4294965248 }
 0x124   :  { %542 = vsyncpa [#allocation3], 1 }

</bundles_post_ra>
